<compile_context>
chip_gen: v7x
topology: tpu7x:2x2x1
jax: 0.10.0
libtpu: 0.0.40
codegen_flags: <defaults>
</compile_context>

<pallas_src>
import functools

import jax
import jax.numpy as jnp
from jax import lax
from jax.experimental import pallas as pl
from jax.experimental.pallas import tpu as pltpu

KSIZE = 5
PAD = KSIZE // 2


def _sublane_multiple(dtype):
    """Packed sublane tile for the dtype: 8 (32-bit), 16 (16-bit), 32 (8-bit)."""
    return max(8, 32 // jnp.dtype(dtype).itemsize)


def _vmem_policy():
    """(per-input-block byte budget, vmem_limit_bytes), generation-aware."""
    budget = 4 * 1024 * 1024          # conservative defaults, safe everywhere
    limit = 32 * 1024 * 1024
    try:
        info = pltpu.get_tpu_info()
        cap = getattr(info, "vmem_capacity_bytes", None)
    except Exception:                  # pragma: no cover - query not available
        cap = None
    if cap is not None:
        if cap >= 96 * 1024 * 1024:    # v5e / v6e: 128 MiB physical VMEM
            budget = 12 * 1024 * 1024  # fewer, larger blocks -> HBM roofline
            limit = 64 * 1024 * 1024
        else:                          # v7x: 64 MiB VMEM per TensorCore
            budget = 6 * 1024 * 1024   # keep double-buffered blocks well inside
            limit = 48 * 1024 * 1024
    return budget, limit


def _pick_c_tile(C, HW, itemsize, sub, budget_bytes):
    """Largest channel tile that (a) divides C, (b) is a multiple of the dtype's
    packed sublane tile (or the full C), and (c) keeps one input block within
    `budget_bytes` so the double-buffered pipeline fits every generation's VMEM."""
    cands = [t for t in range(1, C + 1) if C % t == 0 and (t == C or t % sub == 0)]
    fitting = [t for t in cands if t * HW * itemsize <= budget_bytes]
    # TODO(synk): if C has no sub-multiple divisor and C*HW*itemsize exceeds the
    # budget (e.g. huge prime C), this falls back to the full C; pad C or use a
    # masked non-dividing tile to bound VMEM in that pathological case.
    return max(fitting) if fitting else min(cands)


def _spatial_attn_kernel(w_ref, x_ref, o_ref,
                         sum_ref, max_ref, pad_a_ref, pad_m_ref,
                         *, H, W, C, C_TILE, CHUNK):
    """One (batch n, channel-tile k) grid step.

    w_ref   : SMEM (2*KSIZE*KSIZE,) f32     conv weights, read as scalars
    x_ref   : VMEM (C_TILE, H*W)            lane-dense input tile (native dtype)
    o_ref   : VMEM (H, W)                   output block (written on last C tile)
    sum_ref : VMEM (CHUNK, H*W) f32         running per-sublane-row channel sum
    max_ref : VMEM (CHUNK, H*W) f32         running per-sublane-row channel max
    pad_a_ref, pad_m_ref : VMEM (H+4, W+4) f32   zero-padded conv inputs
    """
    HW = H * W
    k = pl.program_id(1)
    num_k = pl.num_programs(1)

    n_full = C_TILE // CHUNK
    rem = C_TILE - n_full * CHUNK

    # ---- init running accumulators on the first C tile ----
    @pl.when(k == 0)
    def _init():
        sum_ref[...] = jnp.zeros_like(sum_ref)
        max_ref[...] = jnp.full_like(max_ref, -jnp.inf)

    # ---- streaming over this C tile: pure full-density VALU add / max ----
    # (no cross-sublane reduce here; the single axis-0 reduce happens at finalize)
    if n_full > 0:
        part_sum = jnp.zeros((CHUNK, HW), jnp.float32)
        part_max = jnp.full((CHUNK, HW), -jnp.inf, jnp.float32)

        def _chunk_body(i, carry):
            s, m = carry
            off = pl.multiple_of(i * CHUNK, CHUNK)
            blk = x_ref[pl.ds(off, CHUNK), :].astype(jnp.float32)   # (CHUNK, HW)
            return s + blk, jnp.maximum(m, blk)

        part_sum, part_max = lax.fori_loop(
            0, n_full, _chunk_body, (part_sum, part_max), unroll=True)

        sum_ref[...] = sum_ref[...] + part_sum
        max_ref[...] = jnp.maximum(max_ref[...], part_max)

    if rem > 0:
        # Tail (only when the tile is the full, non-CHUNK-multiple C): accumulate
        # the remaining rows into the first `rem` rows of the scratch.
        blk = x_ref[pl.ds(n_full * CHUNK, rem), :].astype(jnp.float32)
        sum_ref[pl.ds(0, rem), :] = sum_ref[pl.ds(0, rem), :] + blk
        max_ref[pl.ds(0, rem), :] = jnp.maximum(max_ref[pl.ds(0, rem), :], blk)

    # ---- last C tile: one sublane reduce + 5x5 conv (2 -> 1) + sigmoid ----
    @pl.when(k == num_k - 1)
    def _finalize():
        avg_flat = jnp.sum(sum_ref[...], axis=0, keepdims=True) * jnp.float32(1.0 / C)
        max_flat = jnp.max(max_ref[...], axis=0, keepdims=True)          # (1, HW)

        # Zero-padded conv inputs live in persistent VMEM scratch (no jnp.pad /
        # relayout copy); re-zeroing the tiny halo each finalize keeps things
        # correct when the parallel grid axis is split across TensorCores.
        pad_a_ref[...] = jnp.zeros_like(pad_a_ref)
        pad_m_ref[...] = jnp.zeros_like(pad_m_ref)
        # TODO(synk): for large H replace this 2*H row scatter with a flat-layout
        # conv via pltpu.roll + boundary masks; negligible at 16x16.
        for y in range(H):
            src = slice(y * W, (y + 1) * W)
            pad_a_ref[PAD + y:PAD + y + 1, PAD:PAD + W] = avg_flat[:, src]
            pad_m_ref[PAD + y:PAD + y + 1, PAD:PAD + W] = max_flat[:, src]

        pa = pad_a_ref[...]                                # (H+4, W+4)
        pm = pad_m_ref[...]
        # Hoist lane-direction (dx) shifts out of the tap loop: 2*KSIZE lane
        # shifts total; the inner loop only does sublane (dy) offsets + scalar FMAs.
        pa_dx = [pa[:, dx:dx + W] for dx in range(KSIZE)]  # each (H+4, W)
        pm_dx = [pm[:, dx:dx + W] for dx in range(KSIZE)]

        acc = jnp.zeros((H, W), jnp.float32)
        for dy in range(KSIZE):
            for dx in range(KSIZE):
                acc = acc + w_ref[dy * KSIZE + dx] * pa_dx[dx][dy:dy + H, :]
                acc = acc + w_ref[KSIZE * KSIZE + dy * KSIZE + dx] \
                    * pm_dx[dx][dy:dy + H, :]

        o_ref[...] = jax.nn.sigmoid(acc).astype(o_ref.dtype)


def spatial_attention(x, w):
    """x: (N, C, H, W), w: (1, 2, KSIZE, KSIZE)  ->  (N, 1, H, W), dtype of x."""
    N, C, H, W = x.shape
    HW = H * W
    Hp, Wp = H + 2 * PAD, W + 2 * PAD

    # Free reshape: NCHW is contiguous in (H, W), so spatial folds into the lanes.
    x_flat = x.reshape(N, C, HW)
    w_flat = w.reshape(-1).astype(jnp.float32)             # 50 scalars -> SMEM

    sub = _sublane_multiple(x.dtype)                       # 8 f32 / 16 bf16 / 32 i8
    budget_bytes, vmem_limit = _vmem_policy()
    c_tile = _pick_c_tile(C, HW, x.dtype.itemsize, sub, budget_bytes)
    num_k = C // c_tile
    chunk = sub

    kernel = functools.partial(_spatial_attn_kernel, H=H, W=W, C=C,
                               C_TILE=c_tile, CHUNK=chunk)

    return pl.pallas_call(
        kernel,
        out_shape=jax.ShapeDtypeStruct((N, 1, H, W), x.dtype),
        grid=(N, num_k),           # N: parallel; C tiles: reduction (innermost)
        in_specs=[
            # tiny weight vector lives in SMEM; read as scalars in the tap loop
            pl.BlockSpec(memory_space=pltpu.MemorySpace.SMEM),
            # lane-dense (C_TILE, H*W) input tile per (n, k) grid step
            pl.BlockSpec((None, c_tile, HW), lambda n, k: (n, k, 0)),
        ],
        # output block is resident across the C-reduction axis; written on last k
        out_specs=pl.BlockSpec((None, None, H, W), lambda n, k: (n, 0, 0, 0)),
        scratch_shapes=[
            pltpu.VMEM((chunk, HW), jnp.float32),           # running channel sum
            pltpu.VMEM((chunk, HW), jnp.float32),           # running channel max
            pltpu.VMEM((Hp, Wp), jnp.float32),              # zero-padded avg map
            pltpu.VMEM((Hp, Wp), jnp.float32),              # zero-padded max map
        ],
        compiler_params=pltpu.CompilerParams(
            dimension_semantics=("parallel", "arbitrary"),
            vmem_limit_bytes=vmem_limit,
        ),
    )(w_flat, x_flat)


def spatial_attention_ref(x, w):
    """Pure-JAX reference (mirrors the PyTorch forward)."""
    avg = jnp.mean(x, axis=1, keepdims=True)
    mx = jnp.max(x, axis=1, keepdims=True)
    combined = jnp.concatenate([avg, mx], axis=1)           # (N, 2, H, W)
    out = lax.conv_general_dilated(
        combined, w,
        window_strides=(1, 1),
        padding=((PAD, PAD), (PAD, PAD)),
        dimension_numbers=("NCHW", "OIHW", "NCHW"),
    )
    return jax.nn.sigmoid(out)


if __name__ == "__main__":
    key = jax.random.PRNGKey(0)
    kx, kw = jax.random.split(key)

    N, C, H, W = 2, 4, 16, 16
    x = jax.random.normal(kx, (N, C, H, W), dtype=jnp.float32)

    # Deterministic Conv2d(2, 1, 5, bias=False) weight init (kaiming-uniform-like).
    fan_in = 2 * KSIZE * KSIZE
    bound = 1.0 / jnp.sqrt(jnp.float32(fan_in))
    w = jax.random.uniform(kw, (1, 2, KSIZE, KSIZE), jnp.float32,
                           minval=-bound, maxval=bound)

    out = spatial_attention(x, w)
    out = jax.block_until_ready(out)

    ref = spatial_attention_ref(x, w)
    assert out.shape == (N, 1, H, W)
    assert jnp.allclose(out, ref, atol=1e-5, rtol=1e-5), "mismatch vs reference"

    print("KERNEL_OK")
</pallas_src>

<mosaic_0001>
module attributes {stable_mosaic.version = 11 : i64} {
  func.func @_spatial_attn_kernel(%arg0: i32, %arg1: i32, %arg2: memref<50xf32, #tpu.memory_space<smem>>, %arg3: memref<1x4x256xf32, #tpu.memory_space<vmem>>, %arg4: memref<1x1x16x16xf32, #tpu.memory_space<vmem>>, %arg5: memref<8x256xf32, #tpu.memory_space<vmem>>, %arg6: memref<8x256xf32, #tpu.memory_space<vmem>>, %arg7: memref<20x20xf32, #tpu.memory_space<vmem>>, %arg8: memref<20x20xf32, #tpu.memory_space<vmem>>) attributes {dimension_semantics = [#tpu.dimension_semantics<parallel>, #tpu.dimension_semantics<arbitrary>], iteration_bounds = array<i64: 2, 1>, scalar_prefetch = 0 : i64, scratch_operands = 4 : i64, tpu.core_type = #tpu.core_type<tc>, window_params = [{transform_indices = @transform_0, window_bounds = array<i64: 50>}, {transform_indices = @transform_1, window_bounds = array<i64: 1, 4, 256>}, {transform_indices = @transform_2, window_bounds = array<i64: 1, 1, 16, 16>}]} {
    %c0_i32 = arith.constant 0 : i32
    %0 = arith.cmpi eq, %arg1, %c0_i32 : i32
    %1 = arith.extui %0 : i1 to i32
    %c0_i32_0 = arith.constant 0 : i32
    %2 = arith.cmpi ne, %1, %c0_i32_0 : i32
    scf.if %2 {
      %cst = arith.constant 0.000000e+00 : f32
      %14 = vector.broadcast %cst : f32 to vector<8x256xf32>
      %c0_13 = arith.constant 0 : index
      %c0_14 = arith.constant 0 : index
      %15 = vector.load %arg5[%c0_13, %c0_14] : memref<8x256xf32, #tpu.memory_space<vmem>>, vector<8x256xf32>
      tpu.vector_store %arg5[%c0_13, %c0_14], %14 {strides = array<i32>} : memref<8x256xf32, #tpu.memory_space<vmem>>, vector<8x256xf32>,
      %cst_15 = arith.constant 0xFF800000 : f32
      %16 = vector.broadcast %cst_15 : f32 to vector<8x256xf32>
      %c0_16 = arith.constant 0 : index
      %c0_17 = arith.constant 0 : index
      %17 = vector.load %arg6[%c0_16, %c0_17] : memref<8x256xf32, #tpu.memory_space<vmem>>, vector<8x256xf32>
      tpu.vector_store %arg6[%c0_16, %c0_17], %16 {strides = array<i32>} : memref<8x256xf32, #tpu.memory_space<vmem>>, vector<8x256xf32>,
    } else {
    }
    %c0 = arith.constant 0 : index
    %c0_1 = arith.constant 0 : index
    %c0_2 = arith.constant 0 : index
    %3 = vector.load %arg3[%c0, %c0_1, %c0_2] : memref<1x4x256xf32, #tpu.memory_space<vmem>>, vector<1x4x256xf32>
    %4 = vector.shape_cast %3 : vector<1x4x256xf32> to vector<4x256xf32>
    %c0_3 = arith.constant 0 : index
    %c0_4 = arith.constant 0 : index
    %5 = vector.load %arg5[%c0_3, %c0_4] : memref<8x256xf32, #tpu.memory_space<vmem>>, vector<4x256xf32>
    %6 = arith.addf %5, %4 : vector<4x256xf32>
    %c0_5 = arith.constant 0 : index
    %c0_6 = arith.constant 0 : index
    %7 = vector.load %arg5[%c0_5, %c0_6] : memref<8x256xf32, #tpu.memory_space<vmem>>, vector<4x256xf32>
    tpu.vector_store %arg5[%c0_5, %c0_6], %6 {strides = array<i32>} : memref<8x256xf32, #tpu.memory_space<vmem>>, vector<4x256xf32>,
    %c0_7 = arith.constant 0 : index
    %c0_8 = arith.constant 0 : index
    %8 = vector.load %arg6[%c0_7, %c0_8] : memref<8x256xf32, #tpu.memory_space<vmem>>, vector<4x256xf32>
    %9 = arith.maximumf %8, %4 : vector<4x256xf32>
    %c0_9 = arith.constant 0 : index
    %c0_10 = arith.constant 0 : index
    %10 = vector.load %arg6[%c0_9, %c0_10] : memref<8x256xf32, #tpu.memory_space<vmem>>, vector<4x256xf32>
    tpu.vector_store %arg6[%c0_9, %c0_10], %9 {strides = array<i32>} : memref<8x256xf32, #tpu.memory_space<vmem>>, vector<4x256xf32>,
    %c0_i32_11 = arith.constant 0 : i32
    %11 = arith.cmpi eq, %arg1, %c0_i32_11 : i32
    %12 = arith.extui %11 : i1 to i32
    %c0_i32_12 = arith.constant 0 : i32
    %13 = arith.cmpi ne, %12, %c0_i32_12 : i32
    scf.if %13 {
      %c0_13 = arith.constant 0 : index
      %c0_14 = arith.constant 0 : index
      %14 = vector.load %arg5[%c0_13, %c0_14] : memref<8x256xf32, #tpu.memory_space<vmem>>, vector<8x256xf32>
      %cst = arith.constant dense<0.000000e+00> : vector<256xf32>
      %15 = vector.multi_reduction <add>, %14, %cst [0] : vector<8x256xf32> to vector<256xf32>
      %16 = vector.shape_cast %15 : vector<256xf32> to vector<1x256xf32>
      %cst_15 = arith.constant 2.500000e-01 : f32
      %17 = vector.broadcast %cst_15 : f32 to vector<1x256xf32>
      %18 = arith.mulf %16, %17 : vector<1x256xf32>
      %c0_16 = arith.constant 0 : index
      %c0_17 = arith.constant 0 : index
      %19 = vector.load %arg6[%c0_16, %c0_17] : memref<8x256xf32, #tpu.memory_space<vmem>>, vector<8x256xf32>
      %cst_18 = arith.constant dense<0xFF800000> : vector<256xf32>
      %20 = vector.multi_reduction <maximumf>, %19, %cst_18 [0] : vector<8x256xf32> to vector<256xf32>
      %21 = vector.shape_cast %20 : vector<256xf32> to vector<1x256xf32>
      %cst_19 = arith.constant 0.000000e+00 : f32
      %22 = vector.broadcast %cst_19 : f32 to vector<20x20xf32>
      %c0_20 = arith.constant 0 : index
      %c0_21 = arith.constant 0 : index
      %23 = vector.load %arg7[%c0_20, %c0_21] : memref<20x20xf32, #tpu.memory_space<vmem>>, vector<20x20xf32>
      tpu.vector_store %arg7[%c0_20, %c0_21], %22 {strides = array<i32>} : memref<20x20xf32, #tpu.memory_space<vmem>>, vector<20x20xf32>,
      %cst_22 = arith.constant 0.000000e+00 : f32
      %24 = vector.broadcast %cst_22 : f32 to vector<20x20xf32>
      %c0_23 = arith.constant 0 : index
      %c0_24 = arith.constant 0 : index
      %25 = vector.load %arg8[%c0_23, %c0_24] : memref<20x20xf32, #tpu.memory_space<vmem>>, vector<20x20xf32>
      tpu.vector_store %arg8[%c0_23, %c0_24], %24 {strides = array<i32>} : memref<20x20xf32, #tpu.memory_space<vmem>>, vector<20x20xf32>,
      %26 = vector.extract_strided_slice %18 {offsets = [0, 0], sizes = [1, 16], strides = [1, 1]} : vector<1x256xf32> to vector<1x16xf32>
      %c2 = arith.constant 2 : index
      %c2_25 = arith.constant 2 : index
      %27 = vector.load %arg7[%c2, %c2_25] : memref<20x20xf32, #tpu.memory_space<vmem>>, vector<1x16xf32>
      tpu.vector_store %arg7[%c2, %c2_25], %26 {strides = array<i32>} : memref<20x20xf32, #tpu.memory_space<vmem>>, vector<1x16xf32>,
      %28 = vector.extract_strided_slice %21 {offsets = [0, 0], sizes = [1, 16], strides = [1, 1]} : vector<1x256xf32> to vector<1x16xf32>
      %c2_26 = arith.constant 2 : index
      %c2_27 = arith.constant 2 : index
      %29 = vector.load %arg8[%c2_26, %c2_27] : memref<20x20xf32, #tpu.memory_space<vmem>>, vector<1x16xf32>
      tpu.vector_store %arg8[%c2_26, %c2_27], %28 {strides = array<i32>} : memref<20x20xf32, #tpu.memory_space<vmem>>, vector<1x16xf32>,
      %30 = vector.extract_strided_slice %18 {offsets = [0, 16], sizes = [1, 16], strides = [1, 1]} : vector<1x256xf32> to vector<1x16xf32>
      %c3 = arith.constant 3 : index
      %c2_28 = arith.constant 2 : index
      %31 = vector.load %arg7[%c3, %c2_28] : memref<20x20xf32, #tpu.memory_space<vmem>>, vector<1x16xf32>
      tpu.vector_store %arg7[%c3, %c2_28], %30 {strides = array<i32>} : memref<20x20xf32, #tpu.memory_space<vmem>>, vector<1x16xf32>,
      %32 = vector.extract_strided_slice %21 {offsets = [0, 16], sizes = [1, 16], strides = [1, 1]} : vector<1x256xf32> to vector<1x16xf32>
      %c3_29 = arith.constant 3 : index
      %c2_30 = arith.constant 2 : index
      %33 = vector.load %arg8[%c3_29, %c2_30] : memref<20x20xf32, #tpu.memory_space<vmem>>, vector<1x16xf32>
      tpu.vector_store %arg8[%c3_29, %c2_30], %32 {strides = array<i32>} : memref<20x20xf32, #tpu.memory_space<vmem>>, vector<1x16xf32>,
      %34 = vector.extract_strided_slice %18 {offsets = [0, 32], sizes = [1, 16], strides = [1, 1]} : vector<1x256xf32> to vector<1x16xf32>
      %c4 = arith.constant 4 : index
      %c2_31 = arith.constant 2 : index
      %35 = vector.load %arg7[%c4, %c2_31] : memref<20x20xf32, #tpu.memory_space<vmem>>, vector<1x16xf32>
      tpu.vector_store %arg7[%c4, %c2_31], %34 {strides = array<i32>} : memref<20x20xf32, #tpu.memory_space<vmem>>, vector<1x16xf32>,
      %36 = vector.extract_strided_slice %21 {offsets = [0, 32], sizes = [1, 16], strides = [1, 1]} : vector<1x256xf32> to vector<1x16xf32>
      %c4_32 = arith.constant 4 : index
      %c2_33 = arith.constant 2 : index
      %37 = vector.load %arg8[%c4_32, %c2_33] : memref<20x20xf32, #tpu.memory_space<vmem>>, vector<1x16xf32>
      tpu.vector_store %arg8[%c4_32, %c2_33], %36 {strides = array<i32>} : memref<20x20xf32, #tpu.memory_space<vmem>>, vector<1x16xf32>,
      %38 = vector.extract_strided_slice %18 {offsets = [0, 48], sizes = [1, 16], strides = [1, 1]} : vector<1x256xf32> to vector<1x16xf32>
      %c5 = arith.constant 5 : index
      %c2_34 = arith.constant 2 : index
      %39 = vector.load %arg7[%c5, %c2_34] : memref<20x20xf32, #tpu.memory_space<vmem>>, vector<1x16xf32>
      tpu.vector_store %arg7[%c5, %c2_34], %38 {strides = array<i32>} : memref<20x20xf32, #tpu.memory_space<vmem>>, vector<1x16xf32>,
      %40 = vector.extract_strided_slice %21 {offsets = [0, 48], sizes = [1, 16], strides = [1, 1]} : vector<1x256xf32> to vector<1x16xf32>
      %c5_35 = arith.constant 5 : index
      %c2_36 = arith.constant 2 : index
      %41 = vector.load %arg8[%c5_35, %c2_36] : memref<20x20xf32, #tpu.memory_space<vmem>>, vector<1x16xf32>
      tpu.vector_store %arg8[%c5_35, %c2_36], %40 {strides = array<i32>} : memref<20x20xf32, #tpu.memory_space<vmem>>, vector<1x16xf32>,
      %42 = vector.extract_strided_slice %18 {offsets = [0, 64], sizes = [1, 16], strides = [1, 1]} : vector<1x256xf32> to vector<1x16xf32>
      %c6 = arith.constant 6 : index
      %c2_37 = arith.constant 2 : index
      %43 = vector.load %arg7[%c6, %c2_37] : memref<20x20xf32, #tpu.memory_space<vmem>>, vector<1x16xf32>
      tpu.vector_store %arg7[%c6, %c2_37], %42 {strides = array<i32>} : memref<20x20xf32, #tpu.memory_space<vmem>>, vector<1x16xf32>,
      %44 = vector.extract_strided_slice %21 {offsets = [0, 64], sizes = [1, 16], strides = [1, 1]} : vector<1x256xf32> to vector<1x16xf32>
      %c6_38 = arith.constant 6 : index
      %c2_39 = arith.constant 2 : index
      %45 = vector.load %arg8[%c6_38, %c2_39] : memref<20x20xf32, #tpu.memory_space<vmem>>, vector<1x16xf32>
      tpu.vector_store %arg8[%c6_38, %c2_39], %44 {strides = array<i32>} : memref<20x20xf32, #tpu.memory_space<vmem>>, vector<1x16xf32>,
      %46 = vector.extract_strided_slice %18 {offsets = [0, 80], sizes = [1, 16], strides = [1, 1]} : vector<1x256xf32> to vector<1x16xf32>
      %c7 = arith.constant 7 : index
      %c2_40 = arith.constant 2 : index
      %47 = vector.load %arg7[%c7, %c2_40] : memref<20x20xf32, #tpu.memory_space<vmem>>, vector<1x16xf32>
      tpu.vector_store %arg7[%c7, %c2_40], %46 {strides = array<i32>} : memref<20x20xf32, #tpu.memory_space<vmem>>, vector<1x16xf32>,
      %48 = vector.extract_strided_slice %21 {offsets = [0, 80], sizes = [1, 16], strides = [1, 1]} : vector<1x256xf32> to vector<1x16xf32>
      %c7_41 = arith.constant 7 : index
      %c2_42 = arith.constant 2 : index
      %49 = vector.load %arg8[%c7_41, %c2_42] : memref<20x20xf32, #tpu.memory_space<vmem>>, vector<1x16xf32>
      tpu.vector_store %arg8[%c7_41, %c2_42], %48 {strides = array<i32>} : memref<20x20xf32, #tpu.memory_space<vmem>>, vector<1x16xf32>,
      %50 = vector.extract_strided_slice %18 {offsets = [0, 96], sizes = [1, 16], strides = [1, 1]} : vector<1x256xf32> to vector<1x16xf32>
      %c8 = arith.constant 8 : index
      %c2_43 = arith.constant 2 : index
      %51 = vector.load %arg7[%c8, %c2_43] : memref<20x20xf32, #tpu.memory_space<vmem>>, vector<1x16xf32>
      tpu.vector_store %arg7[%c8, %c2_43], %50 {strides = array<i32>} : memref<20x20xf32, #tpu.memory_space<vmem>>, vector<1x16xf32>,
      %52 = vector.extract_strided_slice %21 {offsets = [0, 96], sizes = [1, 16], strides = [1, 1]} : vector<1x256xf32> to vector<1x16xf32>
      %c8_44 = arith.constant 8 : index
      %c2_45 = arith.constant 2 : index
      %53 = vector.load %arg8[%c8_44, %c2_45] : memref<20x20xf32, #tpu.memory_space<vmem>>, vector<1x16xf32>
      tpu.vector_store %arg8[%c8_44, %c2_45], %52 {strides = array<i32>} : memref<20x20xf32, #tpu.memory_space<vmem>>, vector<1x16xf32>,
      %54 = vector.extract_strided_slice %18 {offsets = [0, 112], sizes = [1, 16], strides = [1, 1]} : vector<1x256xf32> to vector<1x16xf32>
      %c9 = arith.constant 9 : index
      %c2_46 = arith.constant 2 : index
      %55 = vector.load %arg7[%c9, %c2_46] : memref<20x20xf32, #tpu.memory_space<vmem>>, vector<1x16xf32>
      tpu.vector_store %arg7[%c9, %c2_46], %54 {strides = array<i32>} : memref<20x20xf32, #tpu.memory_space<vmem>>, vector<1x16xf32>,
      %56 = vector.extract_strided_slice %21 {offsets = [0, 112], sizes = [1, 16], strides = [1, 1]} : vector<1x256xf32> to vector<1x16xf32>
      %c9_47 = arith.constant 9 : index
      %c2_48 = arith.constant 2 : index
      %57 = vector.load %arg8[%c9_47, %c2_48] : memref<20x20xf32, #tpu.memory_space<vmem>>, vector<1x16xf32>
      tpu.vector_store %arg8[%c9_47, %c2_48], %56 {strides = array<i32>} : memref<20x20xf32, #tpu.memory_space<vmem>>, vector<1x16xf32>,
      %58 = vector.extract_strided_slice %18 {offsets = [0, 128], sizes = [1, 16], strides = [1, 1]} : vector<1x256xf32> to vector<1x16xf32>
      %c10 = arith.constant 10 : index
      %c2_49 = arith.constant 2 : index
      %59 = vector.load %arg7[%c10, %c2_49] : memref<20x20xf32, #tpu.memory_space<vmem>>, vector<1x16xf32>
      tpu.vector_store %arg7[%c10, %c2_49], %58 {strides = array<i32>} : memref<20x20xf32, #tpu.memory_space<vmem>>, vector<1x16xf32>,
      %60 = vector.extract_strided_slice %21 {offsets = [0, 128], sizes = [1, 16], strides = [1, 1]} : vector<1x256xf32> to vector<1x16xf32>
      %c10_50 = arith.constant 10 : index
      %c2_51 = arith.constant 2 : index
      %61 = vector.load %arg8[%c10_50, %c2_51] : memref<20x20xf32, #tpu.memory_space<vmem>>, vector<1x16xf32>
      tpu.vector_store %arg8[%c10_50, %c2_51], %60 {strides = array<i32>} : memref<20x20xf32, #tpu.memory_space<vmem>>, vector<1x16xf32>,
      %62 = vector.extract_strided_slice %18 {offsets = [0, 144], sizes = [1, 16], strides = [1, 1]} : vector<1x256xf32> to vector<1x16xf32>
      %c11 = arith.constant 11 : index
      %c2_52 = arith.constant 2 : index
      %63 = vector.load %arg7[%c11, %c2_52] : memref<20x20xf32, #tpu.memory_space<vmem>>, vector<1x16xf32>
      tpu.vector_store %arg7[%c11, %c2_52], %62 {strides = array<i32>} : memref<20x20xf32, #tpu.memory_space<vmem>>, vector<1x16xf32>,
      %64 = vector.extract_strided_slice %21 {offsets = [0, 144], sizes = [1, 16], strides = [1, 1]} : vector<1x256xf32> to vector<1x16xf32>
      %c11_53 = arith.constant 11 : index
      %c2_54 = arith.constant 2 : index
      %65 = vector.load %arg8[%c11_53, %c2_54] : memref<20x20xf32, #tpu.memory_space<vmem>>, vector<1x16xf32>
      tpu.vector_store %arg8[%c11_53, %c2_54], %64 {strides = array<i32>} : memref<20x20xf32, #tpu.memory_space<vmem>>, vector<1x16xf32>,
      %66 = vector.extract_strided_slice %18 {offsets = [0, 160], sizes = [1, 16], strides = [1, 1]} : vector<1x256xf32> to vector<1x16xf32>
      %c12 = arith.constant 12 : index
      %c2_55 = arith.constant 2 : index
      %67 = vector.load %arg7[%c12, %c2_55] : memref<20x20xf32, #tpu.memory_space<vmem>>, vector<1x16xf32>
      tpu.vector_store %arg7[%c12, %c2_55], %66 {strides = array<i32>} : memref<20x20xf32, #tpu.memory_space<vmem>>, vector<1x16xf32>,
      %68 = vector.extract_strided_slice %21 {offsets = [0, 160], sizes = [1, 16], strides = [1, 1]} : vector<1x256xf32> to vector<1x16xf32>
      %c12_56 = arith.constant 12 : index
      %c2_57 = arith.constant 2 : index
      %69 = vector.load %arg8[%c12_56, %c2_57] : memref<20x20xf32, #tpu.memory_space<vmem>>, vector<1x16xf32>
      tpu.vector_store %arg8[%c12_56, %c2_57], %68 {strides = array<i32>} : memref<20x20xf32, #tpu.memory_space<vmem>>, vector<1x16xf32>,
      %70 = vector.extract_strided_slice %18 {offsets = [0, 176], sizes = [1, 16], strides = [1, 1]} : vector<1x256xf32> to vector<1x16xf32>
      %c13 = arith.constant 13 : index
      %c2_58 = arith.constant 2 : index
      %71 = vector.load %arg7[%c13, %c2_58] : memref<20x20xf32, #tpu.memory_space<vmem>>, vector<1x16xf32>
      tpu.vector_store %arg7[%c13, %c2_58], %70 {strides = array<i32>} : memref<20x20xf32, #tpu.memory_space<vmem>>, vector<1x16xf32>,
      %72 = vector.extract_strided_slice %21 {offsets = [0, 176], sizes = [1, 16], strides = [1, 1]} : vector<1x256xf32> to vector<1x16xf32>
      %c13_59 = arith.constant 13 : index
      %c2_60 = arith.constant 2 : index
      %73 = vector.load %arg8[%c13_59, %c2_60] : memref<20x20xf32, #tpu.memory_space<vmem>>, vector<1x16xf32>
      tpu.vector_store %arg8[%c13_59, %c2_60], %72 {strides = array<i32>} : memref<20x20xf32, #tpu.memory_space<vmem>>, vector<1x16xf32>,
      %74 = vector.extract_strided_slice %18 {offsets = [0, 192], sizes = [1, 16], strides = [1, 1]} : vector<1x256xf32> to vector<1x16xf32>
      %c14 = arith.constant 14 : index
      %c2_61 = arith.constant 2 : index
      %75 = vector.load %arg7[%c14, %c2_61] : memref<20x20xf32, #tpu.memory_space<vmem>>, vector<1x16xf32>
      tpu.vector_store %arg7[%c14, %c2_61], %74 {strides = array<i32>} : memref<20x20xf32, #tpu.memory_space<vmem>>, vector<1x16xf32>,
      %76 = vector.extract_strided_slice %21 {offsets = [0, 192], sizes = [1, 16], strides = [1, 1]} : vector<1x256xf32> to vector<1x16xf32>
      %c14_62 = arith.constant 14 : index
      %c2_63 = arith.constant 2 : index
      %77 = vector.load %arg8[%c14_62, %c2_63] : memref<20x20xf32, #tpu.memory_space<vmem>>, vector<1x16xf32>
      tpu.vector_store %arg8[%c14_62, %c2_63], %76 {strides = array<i32>} : memref<20x20xf32, #tpu.memory_space<vmem>>, vector<1x16xf32>,
      %78 = vector.extract_strided_slice %18 {offsets = [0, 208], sizes = [1, 16], strides = [1, 1]} : vector<1x256xf32> to vector<1x16xf32>
      %c15 = arith.constant 15 : index
      %c2_64 = arith.constant 2 : index
      %79 = vector.load %arg7[%c15, %c2_64] : memref<20x20xf32, #tpu.memory_space<vmem>>, vector<1x16xf32>
      tpu.vector_store %arg7[%c15, %c2_64], %78 {strides = array<i32>} : memref<20x20xf32, #tpu.memory_space<vmem>>, vector<1x16xf32>,
      %80 = vector.extract_strided_slice %21 {offsets = [0, 208], sizes = [1, 16], strides = [1, 1]} : vector<1x256xf32> to vector<1x16xf32>
      %c15_65 = arith.constant 15 : index
      %c2_66 = arith.constant 2 : index
      %81 = vector.load %arg8[%c15_65, %c2_66] : memref<20x20xf32, #tpu.memory_space<vmem>>, vector<1x16xf32>
      tpu.vector_store %arg8[%c15_65, %c2_66], %80 {strides = array<i32>} : memref<20x20xf32, #tpu.memory_space<vmem>>, vector<1x16xf32>,
      %82 = vector.extract_strided_slice %18 {offsets = [0, 224], sizes = [1, 16], strides = [1, 1]} : vector<1x256xf32> to vector<1x16xf32>
      %c16 = arith.constant 16 : index
      %c2_67 = arith.constant 2 : index
      %83 = vector.load %arg7[%c16, %c2_67] : memref<20x20xf32, #tpu.memory_space<vmem>>, vector<1x16xf32>
      tpu.vector_store %arg7[%c16, %c2_67], %82 {strides = array<i32>} : memref<20x20xf32, #tpu.memory_space<vmem>>, vector<1x16xf32>,
      %84 = vector.extract_strided_slice %21 {offsets = [0, 224], sizes = [1, 16], strides = [1, 1]} : vector<1x256xf32> to vector<1x16xf32>
      %c16_68 = arith.constant 16 : index
      %c2_69 = arith.constant 2 : index
      %85 = vector.load %arg8[%c16_68, %c2_69] : memref<20x20xf32, #tpu.memory_space<vmem>>, vector<1x16xf32>
      tpu.vector_store %arg8[%c16_68, %c2_69], %84 {strides = array<i32>} : memref<20x20xf32, #tpu.memory_space<vmem>>, vector<1x16xf32>,
      %86 = vector.extract_strided_slice %18 {offsets = [0, 240], sizes = [1, 16], strides = [1, 1]} : vector<1x256xf32> to vector<1x16xf32>
      %c17 = arith.constant 17 : index
      %c2_70 = arith.constant 2 : index
      %87 = vector.load %arg7[%c17, %c2_70] : memref<20x20xf32, #tpu.memory_space<vmem>>, vector<1x16xf32>
      tpu.vector_store %arg7[%c17, %c2_70], %86 {strides = array<i32>} : memref<20x20xf32, #tpu.memory_space<vmem>>, vector<1x16xf32>,
      %88 = vector.extract_strided_slice %21 {offsets = [0, 240], sizes = [1, 16], strides = [1, 1]} : vector<1x256xf32> to vector<1x16xf32>
      %c17_71 = arith.constant 17 : index
      %c2_72 = arith.constant 2 : index
      %89 = vector.load %arg8[%c17_71, %c2_72] : memref<20x20xf32, #tpu.memory_space<vmem>>, vector<1x16xf32>
      tpu.vector_store %arg8[%c17_71, %c2_72], %88 {strides = array<i32>} : memref<20x20xf32, #tpu.memory_space<vmem>>, vector<1x16xf32>,
      %c0_73 = arith.constant 0 : index
      %c0_74 = arith.constant 0 : index
      %90 = vector.load %arg7[%c0_73, %c0_74] : memref<20x20xf32, #tpu.memory_space<vmem>>, vector<20x20xf32>
      %c0_75 = arith.constant 0 : index
      %c0_76 = arith.constant 0 : index
      %91 = vector.load %arg8[%c0_75, %c0_76] : memref<20x20xf32, #tpu.memory_space<vmem>>, vector<20x20xf32>
      %92 = vector.extract_strided_slice %90 {offsets = [0, 0], sizes = [20, 16], strides = [1, 1]} : vector<20x20xf32> to vector<20x16xf32>
      %93 = vector.extract_strided_slice %90 {offsets = [0, 1], sizes = [20, 16], strides = [1, 1]} : vector<20x20xf32> to vector<20x16xf32>
      %94 = vector.extract_strided_slice %90 {offsets = [0, 2], sizes = [20, 16], strides = [1, 1]} : vector<20x20xf32> to vector<20x16xf32>
      %95 = vector.extract_strided_slice %90 {offsets = [0, 3], sizes = [20, 16], strides = [1, 1]} : vector<20x20xf32> to vector<20x16xf32>
      %96 = vector.extract_strided_slice %90 {offsets = [0, 4], sizes = [20, 16], strides = [1, 1]} : vector<20x20xf32> to vector<20x16xf32>
      %97 = vector.extract_strided_slice %91 {offsets = [0, 0], sizes = [20, 16], strides = [1, 1]} : vector<20x20xf32> to vector<20x16xf32>
      %98 = vector.extract_strided_slice %91 {offsets = [0, 1], sizes = [20, 16], strides = [1, 1]} : vector<20x20xf32> to vector<20x16xf32>
      %99 = vector.extract_strided_slice %91 {offsets = [0, 2], sizes = [20, 16], strides = [1, 1]} : vector<20x20xf32> to vector<20x16xf32>
      %100 = vector.extract_strided_slice %91 {offsets = [0, 3], sizes = [20, 16], strides = [1, 1]} : vector<20x20xf32> to vector<20x16xf32>
      %101 = vector.extract_strided_slice %91 {offsets = [0, 4], sizes = [20, 16], strides = [1, 1]} : vector<20x20xf32> to vector<20x16xf32>
      %cst_77 = arith.constant 0.000000e+00 : f32
      %102 = vector.broadcast %cst_77 : f32 to vector<16x16xf32>
      %c0_78 = arith.constant 0 : index
      %103 = memref.load %arg2[%c0_78] : memref<50xf32, #tpu.memory_space<smem>>
      %104 = vector.extract_strided_slice %92 {offsets = [0, 0], sizes = [16, 16], strides = [1, 1]} : vector<20x16xf32> to vector<16x16xf32>
      %105 = vector.broadcast %103 : f32 to vector<16x16xf32>
      %106 = arith.mulf %105, %104 : vector<16x16xf32>
      %107 = arith.addf %102, %106 : vector<16x16xf32>
      %c25 = arith.constant 25 : index
      %108 = memref.load %arg2[%c25] : memref<50xf32, #tpu.memory_space<smem>>
      %109 = vector.extract_strided_slice %97 {offsets = [0, 0], sizes = [16, 16], strides = [1, 1]} : vector<20x16xf32> to vector<16x16xf32>
      %110 = vector.broadcast %108 : f32 to vector<16x16xf32>
      %111 = arith.mulf %110, %109 : vector<16x16xf32>
      %112 = arith.addf %107, %111 : vector<16x16xf32>
      %c1 = arith.constant 1 : index
      %113 = memref.load %arg2[%c1] : memref<50xf32, #tpu.memory_space<smem>>
      %114 = vector.extract_strided_slice %93 {offsets = [0, 0], sizes = [16, 16], strides = [1, 1]} : vector<20x16xf32> to vector<16x16xf32>
      %115 = vector.broadcast %113 : f32 to vector<16x16xf32>
      %116 = arith.mulf %115, %114 : vector<16x16xf32>
      %117 = arith.addf %112, %116 : vector<16x16xf32>
      %c26 = arith.constant 26 : index
      %118 = memref.load %arg2[%c26] : memref<50xf32, #tpu.memory_space<smem>>
      %119 = vector.extract_strided_slice %98 {offsets = [0, 0], sizes = [16, 16], strides = [1, 1]} : vector<20x16xf32> to vector<16x16xf32>
      %120 = vector.broadcast %118 : f32 to vector<16x16xf32>
      %121 = arith.mulf %120, %119 : vector<16x16xf32>
      %122 = arith.addf %117, %121 : vector<16x16xf32>
      %c2_79 = arith.constant 2 : index
      %123 = memref.load %arg2[%c2_79] : memref<50xf32, #tpu.memory_space<smem>>
      %124 = vector.extract_strided_slice %94 {offsets = [0, 0], sizes = [16, 16], strides = [1, 1]} : vector<20x16xf32> to vector<16x16xf32>
      %125 = vector.broadcast %123 : f32 to vector<16x16xf32>
      %126 = arith.mulf %125, %124 : vector<16x16xf32>
      %127 = arith.addf %122, %126 : vector<16x16xf32>
      %c27 = arith.constant 27 : index
      %128 = memref.load %arg2[%c27] : memref<50xf32, #tpu.memory_space<smem>>
      %129 = vector.extract_strided_slice %99 {offsets = [0, 0], sizes = [16, 16], strides = [1, 1]} : vector<20x16xf32> to vector<16x16xf32>
      %130 = vector.broadcast %128 : f32 to vector<16x16xf32>
      %131 = arith.mulf %130, %129 : vector<16x16xf32>
      %132 = arith.addf %127, %131 : vector<16x16xf32>
      %c3_80 = arith.constant 3 : index
      %133 = memref.load %arg2[%c3_80] : memref<50xf32, #tpu.memory_space<smem>>
      %134 = vector.extract_strided_slice %95 {offsets = [0, 0], sizes = [16, 16], strides = [1, 1]} : vector<20x16xf32> to vector<16x16xf32>
      %135 = vector.broadcast %133 : f32 to vector<16x16xf32>
      %136 = arith.mulf %135, %134 : vector<16x16xf32>
      %137 = arith.addf %132, %136 : vector<16x16xf32>
      %c28 = arith.constant 28 : index
      %138 = memref.load %arg2[%c28] : memref<50xf32, #tpu.memory_space<smem>>
      %139 = vector.extract_strided_slice %100 {offsets = [0, 0], sizes = [16, 16], strides = [1, 1]} : vector<20x16xf32> to vector<16x16xf32>
      %140 = vector.broadcast %138 : f32 to vector<16x16xf32>
      %141 = arith.mulf %140, %139 : vector<16x16xf32>
      %142 = arith.addf %137, %141 : vector<16x16xf32>
      %c4_81 = arith.constant 4 : index
      %143 = memref.load %arg2[%c4_81] : memref<50xf32, #tpu.memory_space<smem>>
      %144 = vector.extract_strided_slice %96 {offsets = [0, 0], sizes = [16, 16], strides = [1, 1]} : vector<20x16xf32> to vector<16x16xf32>
      %145 = vector.broadcast %143 : f32 to vector<16x16xf32>
      %146 = arith.mulf %145, %144 : vector<16x16xf32>
      %147 = arith.addf %142, %146 : vector<16x16xf32>
      %c29 = arith.constant 29 : index
      %148 = memref.load %arg2[%c29] : memref<50xf32, #tpu.memory_space<smem>>
      %149 = vector.extract_strided_slice %101 {offsets = [0, 0], sizes = [16, 16], strides = [1, 1]} : vector<20x16xf32> to vector<16x16xf32>
      %150 = vector.broadcast %148 : f32 to vector<16x16xf32>
      %151 = arith.mulf %150, %149 : vector<16x16xf32>
      %152 = arith.addf %147, %151 : vector<16x16xf32>
      %c5_82 = arith.constant 5 : index
      %153 = memref.load %arg2[%c5_82] : memref<50xf32, #tpu.memory_space<smem>>
      %154 = vector.extract_strided_slice %92 {offsets = [1, 0], sizes = [16, 16], strides = [1, 1]} : vector<20x16xf32> to vector<16x16xf32>
      %155 = vector.broadcast %153 : f32 to vector<16x16xf32>
      %156 = arith.mulf %155, %154 : vector<16x16xf32>
      %157 = arith.addf %152, %156 : vector<16x16xf32>
      %c30 = arith.constant 30 : index
      %158 = memref.load %arg2[%c30] : memref<50xf32, #tpu.memory_space<smem>>
      %159 = vector.extract_strided_slice %97 {offsets = [1, 0], sizes = [16, 16], strides = [1, 1]} : vector<20x16xf32> to vector<16x16xf32>
      %160 = vector.broadcast %158 : f32 to vector<16x16xf32>
      %161 = arith.mulf %160, %159 : vector<16x16xf32>
      %162 = arith.addf %157, %161 : vector<16x16xf32>
      %c6_83 = arith.constant 6 : index
      %163 = memref.load %arg2[%c6_83] : memref<50xf32, #tpu.memory_space<smem>>
      %164 = vector.extract_strided_slice %93 {offsets = [1, 0], sizes = [16, 16], strides = [1, 1]} : vector<20x16xf32> to vector<16x16xf32>
      %165 = vector.broadcast %163 : f32 to vector<16x16xf32>
      %166 = arith.mulf %165, %164 : vector<16x16xf32>
      %167 = arith.addf %162, %166 : vector<16x16xf32>
      %c31 = arith.constant 31 : index
      %168 = memref.load %arg2[%c31] : memref<50xf32, #tpu.memory_space<smem>>
      %169 = vector.extract_strided_slice %98 {offsets = [1, 0], sizes = [16, 16], strides = [1, 1]} : vector<20x16xf32> to vector<16x16xf32>
      %170 = vector.broadcast %168 : f32 to vector<16x16xf32>
      %171 = arith.mulf %170, %169 : vector<16x16xf32>
      %172 = arith.addf %167, %171 : vector<16x16xf32>
      %c7_84 = arith.constant 7 : index
      %173 = memref.load %arg2[%c7_84] : memref<50xf32, #tpu.memory_space<smem>>
      %174 = vector.extract_strided_slice %94 {offsets = [1, 0], sizes = [16, 16], strides = [1, 1]} : vector<20x16xf32> to vector<16x16xf32>
      %175 = vector.broadcast %173 : f32 to vector<16x16xf32>
      %176 = arith.mulf %175, %174 : vector<16x16xf32>
      %177 = arith.addf %172, %176 : vector<16x16xf32>
      %c32 = arith.constant 32 : index
      %178 = memref.load %arg2[%c32] : memref<50xf32, #tpu.memory_space<smem>>
      %179 = vector.extract_strided_slice %99 {offsets = [1, 0], sizes = [16, 16], strides = [1, 1]} : vector<20x16xf32> to vector<16x16xf32>
      %180 = vector.broadcast %178 : f32 to vector<16x16xf32>
      %181 = arith.mulf %180, %179 : vector<16x16xf32>
      %182 = arith.addf %177, %181 : vector<16x16xf32>
      %c8_85 = arith.constant 8 : index
      %183 = memref.load %arg2[%c8_85] : memref<50xf32, #tpu.memory_space<smem>>
      %184 = vector.extract_strided_slice %95 {offsets = [1, 0], sizes = [16, 16], strides = [1, 1]} : vector<20x16xf32> to vector<16x16xf32>
      %185 = vector.broadcast %183 : f32 to vector<16x16xf32>
      %186 = arith.mulf %185, %184 : vector<16x16xf32>
      %187 = arith.addf %182, %186 : vector<16x16xf32>
      %c33 = arith.constant 33 : index
      %188 = memref.load %arg2[%c33] : memref<50xf32, #tpu.memory_space<smem>>
      %189 = vector.extract_strided_slice %100 {offsets = [1, 0], sizes = [16, 16], strides = [1, 1]} : vector<20x16xf32> to vector<16x16xf32>
      %190 = vector.broadcast %188 : f32 to vector<16x16xf32>
      %191 = arith.mulf %190, %189 : vector<16x16xf32>
      %192 = arith.addf %187, %191 : vector<16x16xf32>
      %c9_86 = arith.constant 9 : index
      %193 = memref.load %arg2[%c9_86] : memref<50xf32, #tpu.memory_space<smem>>
      %194 = vector.extract_strided_slice %96 {offsets = [1, 0], sizes = [16, 16], strides = [1, 1]} : vector<20x16xf32> to vector<16x16xf32>
      %195 = vector.broadcast %193 : f32 to vector<16x16xf32>
      %196 = arith.mulf %195, %194 : vector<16x16xf32>
      %197 = arith.addf %192, %196 : vector<16x16xf32>
      %c34 = arith.constant 34 : index
      %198 = memref.load %arg2[%c34] : memref<50xf32, #tpu.memory_space<smem>>
      %199 = vector.extract_strided_slice %101 {offsets = [1, 0], sizes = [16, 16], strides = [1, 1]} : vector<20x16xf32> to vector<16x16xf32>
      %200 = vector.broadcast %198 : f32 to vector<16x16xf32>
      %201 = arith.mulf %200, %199 : vector<16x16xf32>
      %202 = arith.addf %197, %201 : vector<16x16xf32>
      %c10_87 = arith.constant 10 : index
      %203 = memref.load %arg2[%c10_87] : memref<50xf32, #tpu.memory_space<smem>>
      %204 = vector.extract_strided_slice %92 {offsets = [2, 0], sizes = [16, 16], strides = [1, 1]} : vector<20x16xf32> to vector<16x16xf32>
      %205 = vector.broadcast %203 : f32 to vector<16x16xf32>
      %206 = arith.mulf %205, %204 : vector<16x16xf32>
      %207 = arith.addf %202, %206 : vector<16x16xf32>
      %c35 = arith.constant 35 : index
      %208 = memref.load %arg2[%c35] : memref<50xf32, #tpu.memory_space<smem>>
      %209 = vector.extract_strided_slice %97 {offsets = [2, 0], sizes = [16, 16], strides = [1, 1]} : vector<20x16xf32> to vector<16x16xf32>
      %210 = vector.broadcast %208 : f32 to vector<16x16xf32>
      %211 = arith.mulf %210, %209 : vector<16x16xf32>
      %212 = arith.addf %207, %211 : vector<16x16xf32>
      %c11_88 = arith.constant 11 : index
      %213 = memref.load %arg2[%c11_88] : memref<50xf32, #tpu.memory_space<smem>>
      %214 = vector.extract_strided_slice %93 {offsets = [2, 0], sizes = [16, 16], strides = [1, 1]} : vector<20x16xf32> to vector<16x16xf32>
      %215 = vector.broadcast %213 : f32 to vector<16x16xf32>
      %216 = arith.mulf %215, %214 : vector<16x16xf32>
      %217 = arith.addf %212, %216 : vector<16x16xf32>
      %c36 = arith.constant 36 : index
      %218 = memref.load %arg2[%c36] : memref<50xf32, #tpu.memory_space<smem>>
      %219 = vector.extract_strided_slice %98 {offsets = [2, 0], sizes = [16, 16], strides = [1, 1]} : vector<20x16xf32> to vector<16x16xf32>
      %220 = vector.broadcast %218 : f32 to vector<16x16xf32>
      %221 = arith.mulf %220, %219 : vector<16x16xf32>
      %222 = arith.addf %217, %221 : vector<16x16xf32>
      %c12_89 = arith.constant 12 : index
      %223 = memref.load %arg2[%c12_89] : memref<50xf32, #tpu.memory_space<smem>>
      %224 = vector.extract_strided_slice %94 {offsets = [2, 0], sizes = [16, 16], strides = [1, 1]} : vector<20x16xf32> to vector<16x16xf32>
      %225 = vector.broadcast %223 : f32 to vector<16x16xf32>
      %226 = arith.mulf %225, %224 : vector<16x16xf32>
      %227 = arith.addf %222, %226 : vector<16x16xf32>
      %c37 = arith.constant 37 : index
      %228 = memref.load %arg2[%c37] : memref<50xf32, #tpu.memory_space<smem>>
      %229 = vector.extract_strided_slice %99 {offsets = [2, 0], sizes = [16, 16], strides = [1, 1]} : vector<20x16xf32> to vector<16x16xf32>
      %230 = vector.broadcast %228 : f32 to vector<16x16xf32>
      %231 = arith.mulf %230, %229 : vector<16x16xf32>
      %232 = arith.addf %227, %231 : vector<16x16xf32>
      %c13_90 = arith.constant 13 : index
      %233 = memref.load %arg2[%c13_90] : memref<50xf32, #tpu.memory_space<smem>>
      %234 = vector.extract_strided_slice %95 {offsets = [2, 0], sizes = [16, 16], strides = [1, 1]} : vector<20x16xf32> to vector<16x16xf32>
      %235 = vector.broadcast %233 : f32 to vector<16x16xf32>
      %236 = arith.mulf %235, %234 : vector<16x16xf32>
      %237 = arith.addf %232, %236 : vector<16x16xf32>
      %c38 = arith.constant 38 : index
      %238 = memref.load %arg2[%c38] : memref<50xf32, #tpu.memory_space<smem>>
      %239 = vector.extract_strided_slice %100 {offsets = [2, 0], sizes = [16, 16], strides = [1, 1]} : vector<20x16xf32> to vector<16x16xf32>
      %240 = vector.broadcast %238 : f32 to vector<16x16xf32>
      %241 = arith.mulf %240, %239 : vector<16x16xf32>
      %242 = arith.addf %237, %241 : vector<16x16xf32>
      %c14_91 = arith.constant 14 : index
      %243 = memref.load %arg2[%c14_91] : memref<50xf32, #tpu.memory_space<smem>>
      %244 = vector.extract_strided_slice %96 {offsets = [2, 0], sizes = [16, 16], strides = [1, 1]} : vector<20x16xf32> to vector<16x16xf32>
      %245 = vector.broadcast %243 : f32 to vector<16x16xf32>
      %246 = arith.mulf %245, %244 : vector<16x16xf32>
      %247 = arith.addf %242, %246 : vector<16x16xf32>
      %c39 = arith.constant 39 : index
      %248 = memref.load %arg2[%c39] : memref<50xf32, #tpu.memory_space<smem>>
      %249 = vector.extract_strided_slice %101 {offsets = [2, 0], sizes = [16, 16], strides = [1, 1]} : vector<20x16xf32> to vector<16x16xf32>
      %250 = vector.broadcast %248 : f32 to vector<16x16xf32>
      %251 = arith.mulf %250, %249 : vector<16x16xf32>
      %252 = arith.addf %247, %251 : vector<16x16xf32>
      %c15_92 = arith.constant 15 : index
      %253 = memref.load %arg2[%c15_92] : memref<50xf32, #tpu.memory_space<smem>>
      %254 = vector.extract_strided_slice %92 {offsets = [3, 0], sizes = [16, 16], strides = [1, 1]} : vector<20x16xf32> to vector<16x16xf32>
      %255 = vector.broadcast %253 : f32 to vector<16x16xf32>
      %256 = arith.mulf %255, %254 : vector<16x16xf32>
      %257 = arith.addf %252, %256 : vector<16x16xf32>
      %c40 = arith.constant 40 : index
      %258 = memref.load %arg2[%c40] : memref<50xf32, #tpu.memory_space<smem>>
      %259 = vector.extract_strided_slice %97 {offsets = [3, 0], sizes = [16, 16], strides = [1, 1]} : vector<20x16xf32> to vector<16x16xf32>
      %260 = vector.broadcast %258 : f32 to vector<16x16xf32>
      %261 = arith.mulf %260, %259 : vector<16x16xf32>
      %262 = arith.addf %257, %261 : vector<16x16xf32>
      %c16_93 = arith.constant 16 : index
      %263 = memref.load %arg2[%c16_93] : memref<50xf32, #tpu.memory_space<smem>>
      %264 = vector.extract_strided_slice %93 {offsets = [3, 0], sizes = [16, 16], strides = [1, 1]} : vector<20x16xf32> to vector<16x16xf32>
      %265 = vector.broadcast %263 : f32 to vector<16x16xf32>
      %266 = arith.mulf %265, %264 : vector<16x16xf32>
      %267 = arith.addf %262, %266 : vector<16x16xf32>
      %c41 = arith.constant 41 : index
      %268 = memref.load %arg2[%c41] : memref<50xf32, #tpu.memory_space<smem>>
      %269 = vector.extract_strided_slice %98 {offsets = [3, 0], sizes = [16, 16], strides = [1, 1]} : vector<20x16xf32> to vector<16x16xf32>
      %270 = vector.broadcast %268 : f32 to vector<16x16xf32>
      %271 = arith.mulf %270, %269 : vector<16x16xf32>
      %272 = arith.addf %267, %271 : vector<16x16xf32>
      %c17_94 = arith.constant 17 : index
      %273 = memref.load %arg2[%c17_94] : memref<50xf32, #tpu.memory_space<smem>>
      %274 = vector.extract_strided_slice %94 {offsets = [3, 0], sizes = [16, 16], strides = [1, 1]} : vector<20x16xf32> to vector<16x16xf32>
      %275 = vector.broadcast %273 : f32 to vector<16x16xf32>
      %276 = arith.mulf %275, %274 : vector<16x16xf32>
      %277 = arith.addf %272, %276 : vector<16x16xf32>
      %c42 = arith.constant 42 : index
      %278 = memref.load %arg2[%c42] : memref<50xf32, #tpu.memory_space<smem>>
      %279 = vector.extract_strided_slice %99 {offsets = [3, 0], sizes = [16, 16], strides = [1, 1]} : vector<20x16xf32> to vector<16x16xf32>
      %280 = vector.broadcast %278 : f32 to vector<16x16xf32>
      %281 = arith.mulf %280, %279 : vector<16x16xf32>
      %282 = arith.addf %277, %281 : vector<16x16xf32>
      %c18 = arith.constant 18 : index
      %283 = memref.load %arg2[%c18] : memref<50xf32, #tpu.memory_space<smem>>
      %284 = vector.extract_strided_slice %95 {offsets = [3, 0], sizes = [16, 16], strides = [1, 1]} : vector<20x16xf32> to vector<16x16xf32>
      %285 = vector.broadcast %283 : f32 to vector<16x16xf32>
      %286 = arith.mulf %285, %284 : vector<16x16xf32>
      %287 = arith.addf %282, %286 : vector<16x16xf32>
      %c43 = arith.constant 43 : index
      %288 = memref.load %arg2[%c43] : memref<50xf32, #tpu.memory_space<smem>>
      %289 = vector.extract_strided_slice %100 {offsets = [3, 0], sizes = [16, 16], strides = [1, 1]} : vector<20x16xf32> to vector<16x16xf32>
      %290 = vector.broadcast %288 : f32 to vector<16x16xf32>
      %291 = arith.mulf %290, %289 : vector<16x16xf32>
      %292 = arith.addf %287, %291 : vector<16x16xf32>
      %c19 = arith.constant 19 : index
      %293 = memref.load %arg2[%c19] : memref<50xf32, #tpu.memory_space<smem>>
      %294 = vector.extract_strided_slice %96 {offsets = [3, 0], sizes = [16, 16], strides = [1, 1]} : vector<20x16xf32> to vector<16x16xf32>
      %295 = vector.broadcast %293 : f32 to vector<16x16xf32>
      %296 = arith.mulf %295, %294 : vector<16x16xf32>
      %297 = arith.addf %292, %296 : vector<16x16xf32>
      %c44 = arith.constant 44 : index
      %298 = memref.load %arg2[%c44] : memref<50xf32, #tpu.memory_space<smem>>
      %299 = vector.extract_strided_slice %101 {offsets = [3, 0], sizes = [16, 16], strides = [1, 1]} : vector<20x16xf32> to vector<16x16xf32>
      %300 = vector.broadcast %298 : f32 to vector<16x16xf32>
      %301 = arith.mulf %300, %299 : vector<16x16xf32>
      %302 = arith.addf %297, %301 : vector<16x16xf32>
      %c20 = arith.constant 20 : index
      %303 = memref.load %arg2[%c20] : memref<50xf32, #tpu.memory_space<smem>>
      %304 = vector.extract_strided_slice %92 {offsets = [4, 0], sizes = [16, 16], strides = [1, 1]} : vector<20x16xf32> to vector<16x16xf32>
      %305 = vector.broadcast %303 : f32 to vector<16x16xf32>
      %306 = arith.mulf %305, %304 : vector<16x16xf32>
      %307 = arith.addf %302, %306 : vector<16x16xf32>
      %c45 = arith.constant 45 : index
      %308 = memref.load %arg2[%c45] : memref<50xf32, #tpu.memory_space<smem>>
      %309 = vector.extract_strided_slice %97 {offsets = [4, 0], sizes = [16, 16], strides = [1, 1]} : vector<20x16xf32> to vector<16x16xf32>
      %310 = vector.broadcast %308 : f32 to vector<16x16xf32>
      %311 = arith.mulf %310, %309 : vector<16x16xf32>
      %312 = arith.addf %307, %311 : vector<16x16xf32>
      %c21 = arith.constant 21 : index
      %313 = memref.load %arg2[%c21] : memref<50xf32, #tpu.memory_space<smem>>
      %314 = vector.extract_strided_slice %93 {offsets = [4, 0], sizes = [16, 16], strides = [1, 1]} : vector<20x16xf32> to vector<16x16xf32>
      %315 = vector.broadcast %313 : f32 to vector<16x16xf32>
      %316 = arith.mulf %315, %314 : vector<16x16xf32>
      %317 = arith.addf %312, %316 : vector<16x16xf32>
      %c46 = arith.constant 46 : index
      %318 = memref.load %arg2[%c46] : memref<50xf32, #tpu.memory_space<smem>>
      %319 = vector.extract_strided_slice %98 {offsets = [4, 0], sizes = [16, 16], strides = [1, 1]} : vector<20x16xf32> to vector<16x16xf32>
      %320 = vector.broadcast %318 : f32 to vector<16x16xf32>
      %321 = arith.mulf %320, %319 : vector<16x16xf32>
      %322 = arith.addf %317, %321 : vector<16x16xf32>
      %c22 = arith.constant 22 : index
      %323 = memref.load %arg2[%c22] : memref<50xf32, #tpu.memory_space<smem>>
      %324 = vector.extract_strided_slice %94 {offsets = [4, 0], sizes = [16, 16], strides = [1, 1]} : vector<20x16xf32> to vector<16x16xf32>
      %325 = vector.broadcast %323 : f32 to vector<16x16xf32>
      %326 = arith.mulf %325, %324 : vector<16x16xf32>
      %327 = arith.addf %322, %326 : vector<16x16xf32>
      %c47 = arith.constant 47 : index
      %328 = memref.load %arg2[%c47] : memref<50xf32, #tpu.memory_space<smem>>
      %329 = vector.extract_strided_slice %99 {offsets = [4, 0], sizes = [16, 16], strides = [1, 1]} : vector<20x16xf32> to vector<16x16xf32>
      %330 = vector.broadcast %328 : f32 to vector<16x16xf32>
      %331 = arith.mulf %330, %329 : vector<16x16xf32>
      %332 = arith.addf %327, %331 : vector<16x16xf32>
      %c23 = arith.constant 23 : index
      %333 = memref.load %arg2[%c23] : memref<50xf32, #tpu.memory_space<smem>>
      %334 = vector.extract_strided_slice %95 {offsets = [4, 0], sizes = [16, 16], strides = [1, 1]} : vector<20x16xf32> to vector<16x16xf32>
      %335 = vector.broadcast %333 : f32 to vector<16x16xf32>
      %336 = arith.mulf %335, %334 : vector<16x16xf32>
      %337 = arith.addf %332, %336 : vector<16x16xf32>
      %c48 = arith.constant 48 : index
      %338 = memref.load %arg2[%c48] : memref<50xf32, #tpu.memory_space<smem>>
      %339 = vector.extract_strided_slice %100 {offsets = [4, 0], sizes = [16, 16], strides = [1, 1]} : vector<20x16xf32> to vector<16x16xf32>
      %340 = vector.broadcast %338 : f32 to vector<16x16xf32>
      %341 = arith.mulf %340, %339 : vector<16x16xf32>
      %342 = arith.addf %337, %341 : vector<16x16xf32>
      %c24 = arith.constant 24 : index
      %343 = memref.load %arg2[%c24] : memref<50xf32, #tpu.memory_space<smem>>
      %344 = vector.extract_strided_slice %96 {offsets = [4, 0], sizes = [16, 16], strides = [1, 1]} : vector<20x16xf32> to vector<16x16xf32>
      %345 = vector.broadcast %343 : f32 to vector<16x16xf32>
      %346 = arith.mulf %345, %344 : vector<16x16xf32>
      %347 = arith.addf %342, %346 : vector<16x16xf32>
      %c49 = arith.constant 49 : index
      %348 = memref.load %arg2[%c49] : memref<50xf32, #tpu.memory_space<smem>>
      %349 = vector.extract_strided_slice %101 {offsets = [4, 0], sizes = [16, 16], strides = [1, 1]} : vector<20x16xf32> to vector<16x16xf32>
      %350 = vector.broadcast %348 : f32 to vector<16x16xf32>
      %351 = arith.mulf %350, %349 : vector<16x16xf32>
      %352 = arith.addf %347, %351 : vector<16x16xf32>
      %353 = arith.negf %352 : vector<16x16xf32>
      %354 = math.exp %353 : vector<16x16xf32>
      %cst_95 = arith.constant 1.000000e+00 : f32
      %355 = vector.broadcast %cst_95 : f32 to vector<16x16xf32>
      %356 = arith.addf %355, %354 : vector<16x16xf32>
      %357 = arith.divf %355, %356 : vector<16x16xf32>
      %c0_96 = arith.constant 0 : index
      %c0_97 = arith.constant 0 : index
      %c0_98 = arith.constant 0 : index
      %c0_99 = arith.constant 0 : index
      %358 = vector.load %arg4[%c0_96, %c0_97, %c0_98, %c0_99] : memref<1x1x16x16xf32, #tpu.memory_space<vmem>>, vector<1x1x16x16xf32>
      %359 = vector.shape_cast %358 : vector<1x1x16x16xf32> to vector<16x16xf32>
      %360 = vector.shape_cast %357 : vector<16x16xf32> to vector<1x1x16x16xf32>
      tpu.vector_store %arg4[%c0_96, %c0_97, %c0_98, %c0_99], %360 {strides = array<i32>} : memref<1x1x16x16xf32, #tpu.memory_space<vmem>>, vector<1x1x16x16xf32>,
    } else {
    }
    return
  }
  func.func @transform_0(%arg0: i32, %arg1: i32) -> i32 {
    %c0_i32 = arith.constant 0 : i32
    %c0_i32_0 = arith.constant 0 : i32
    return %c0_i32 : i32
  }
  func.func @transform_1(%arg0: i32, %arg1: i32) -> (i32, i32, i32) {
    %c0_i32 = arith.constant 0 : i32
    %c0_i32_0 = arith.constant 0 : i32
    return %arg0, %arg1, %c0_i32 : i32, i32, i32
  }
  func.func @transform_2(%arg0: i32, %arg1: i32) -> (i32, i32, i32, i32) {
    %c0_i32 = arith.constant 0 : i32
    %c0_i32_0 = arith.constant 0 : i32
    %c0_i32_1 = arith.constant 0 : i32
    %c0_i32_2 = arith.constant 0 : i32
    return %arg0, %c0_i32, %c0_i32_0, %c0_i32_1 : i32, i32, i32, i32
  }
}

</mosaic_0001>

<bundles_post_ra>
// kernel: tpu_custom_call.1
= control target key start
LH: loop header
LB: loop body
LE: loop exit
PB: predicated region body
PF: predicated region fallthrough
CT: control target
= control target key end

     0   :  { %s3002_s0 = inlined_call_operand.hbm [shape: f32[50], index: 0, kind: input, shape index: {}]   ;;  %s3003_s1 = inlined_call_operand.hbm [shape: f32[2,4,256], index: 1, kind: input, shape index: {}]   ;;  %s3004_s2 = inlined_call_operand.hbm [shape: f32[2,1,16,16], index: 2, kind: output, shape index: {}]  }
   0x1   :  { %3050 = sst [smem:[#allocation41_spill]] %s3002_s0 }
   0x2   :  { %3051 = sst [smem:[#allocation42_spill]] %s3003_s1 }
   0x3   :  { %3052 = sst [smem:[#allocation43_spill]] %s3004_s2 }
   0x4   :  { %7 = vsyncpa [#allocation9], 0 }
   0x5   :  { %8 = vsyncpa [#allocation7], 0 }
   0x6   :  { %10 = vsyncpa [#allocation7 + $0x1], 0 }
   0x7   :  { %11 = vsyncpa [#allocation8], 0 }
   0x8   :  { %13 = vsyncpa [#allocation8 + $0x1], 0  ;;  %s1787_s9 = smov 0   ;;  %s1789_s10 = smov 0  }
   0x9   :  { %s1791_s11 = smov 0   ;;  %s1793_s12 = smov 0  }
   0xa   :  { %s1795_s13 = smov 0   ;;  %s1797_s14 = smov 0  }
   0xb LB: > { %3053 = sst [smem:[#allocation15_spill]] %s1731_s9  ;;  %s1453_s15 = sadd.s32 4294967295, %s1751_s14   ;;  %s1751_s14 = sphi %s1797_s14, %s19_s14   ;;  %s1747_s13 = sphi %s1795_s13, %s3163_s13   ;;  %s1743_s12 = sphi %s1793_s12, %s3162_s12   ;;  %s1739_s11 = sphi %s1791_s11, %s3161_s11   ;;  %s1735_s10 = sphi %s1789_s10, %s3160_s10   ;;  %s1731_s9 = sphi %s1787_s9, %s3159_s9  }
   0xc   : > { %3054 = sst [smem:[#allocation16_spill]] %s1735_s10  ;;  %s1454_s16 = sadd.s32 4294967294, %s1751_s14  }
   0xd   : > { %3055 = sst [smem:[#allocation17_spill]] %s1739_s11  ;;  %p74_p0 = scmp.ne.s32.totalorder %s1735_s10, %s1731_s9 }
   0xe   : > { %3056 = sst [smem:[#allocation18_spill]] %s1743_s12  ;;  %p1821_p1 = scmp.eq.s32.totalorder %s1453_s15, 0 }
   0xf   : > { %3057 = sst [smem:[#allocation19_spill]] %s1747_s13  ;;  %p1825_p2 = scmp.eq.s32.totalorder %s1453_s15, 1 }
  0x10   : > { %3058 = sst [smem:[#allocation20_spill]] %s1751_s14  ;;  %p104_p3 = scmp.eq.s32.totalorder %s1454_s16, 1 }
  0x11   : > { %s3059_s17 = scalar_select %p1821_p1, 1, 0 }
  0x12   : > { %p1831_p4 = por %p1821_p1, %p74_p0  ;;  %p1455_p5 = scmp.ge.s32.totalorder %s1751_s14, 1 }
  0x13   : > { %p1836_p6 = por %p104_p3, %p74_p0  ;;  %p111_p7 = scmp.lt.s32.totalorder %s1751_s14, 3 }
  0x14   : > { %s3061_s19 = scalar_select %p1831_p4, 1, 0 }
  0x15   : > { %s3062_s20 = scalar_select %p1836_p6, 1, 0 }
  0x16   : > { %p1841_p8 = pnand %p1455_p5, %p111_p7  ;;  %s31_s22 = sadd.s32 1, %s1747_s13 }
  0x17   : > { %3063 = sst [smem:[#allocation21_spill]] %s3062_s20  ;;  %p1855_p12 = scmp.ge.s32.totalorder %s31_s22, 2 }
  0x18   : > { %p1531_p10 = pneg %p1841_p8  ;;  %s61_s25 = sadd.s32 1, %s1739_s11 }
  0x19   : > { %p68_p13 = scmp.ne.s32.totalorder %s1739_s11, %s1735_s10  ;;  %p69_p0 = scmp.eq.s32.totalorder %s1751_s14, 0 }
  0x1a   : > { %p1851_p11 = pnand %p1531_p10, %p1821_p1  ;;  %s3067_s0 = sld [smem:[#allocation41_spill]] }
  0x1c   : > { %p1624_p5 = pneg %p1851_p11 }
  0x20   : > { %s1622_s28 = scalar_lea.hbm %s3067_s0, 16 }
  0x21   : > { %p1623_p3 = scmp.ne.s32.totalorder %s3067_s0, %s1622_s28  ;;  %p1629_p9 = scmp.lt.u32.totalorder %s1622_s28, %s3067_s0 }
  0x23   : > { %p1625_p7 = pnand %p1624_p5, %p1623_p3 }
  0x25   : > { %p1626_p10 = pneg %p1625_p7 }
  0x27   : > { %p1631_p6 = pnand %p1629_p9, %p1626_p10 }
  0x29   : > { %1634 = shalt.err (!%p1631_p6)
}
  0x2a   : > { %s1753_s5 = smov [#allocation6]   ;;  %s3165_s22 = smov (%p1855_p12, %s31_s22), 0 }
  0x2b   : > { %1534 = dma.hbm_to_smem (!%p1851_p11), %s3067_s0, 16, %s1753_s5, [#allocation9]  }
  0x2c   : > { %3068 = sst [smem:[#allocation22_spill]] %s3165_s22  ;;  %p1886_p6 = por %p69_p0, %p68_p13 }
  0x2d   : > { %p1895_p9 = por %p1825_p2, %p68_p13  ;;  %s56_s16 = ssub.s32 %s1747_s13, %s3165_s22 }
  0x2e   : > { %p1544_p3 = scmp.lt.s32.totalorder %s1751_s14, 2  ;;  %p59_p5 = scmp.eq.s32.totalorder %s56_s16, 0 }
  0x2f   : > { %s3070_s15 = scalar_select %p1895_p9, 1, 0 }
  0x30   : > { %s133_s23 = sand.u32 1, %s1739_s11   ;;  %s1521_s27 = sshll.u32 %s1747_s13, 7 }
  0x31   : > { %3071 = sst [smem:[#allocation23_spill]] %s3070_s15  ;;  %s1458_s24 = sshll.u32 %s133_s23, 3 }
  0x32   : > { %s1904_s26 = scalar_select %p59_p5, %s1739_s11, %s61_s25  }
  0x33   : > { %s3073_s1 = sld [smem:[#allocation42_spill]]  ;;  %s137_s18 = scalar_lea.vmem [#allocation10], %s1458_s24 }
  0x34   : > { %3072 = sst [smem:[#allocation24_spill]] %s1904_s26  ;;  %s147_s3 = sshll.u32 %s137_s18, 4  ;;  %s1912_s3 = int_to_ptr.vmem [resolvable:$true] %s147_s3 }
  0x35   : > { %p1916_p2 = pnand %p1544_p3, %p1886_p6  ;;  %s134_s25 = scalar_lea.sflag [#allocation7], %s133_s23 }
  0x37   : > { %p1637_p12 = pneg %p1916_p2 }
  0x39   : > { %s1910_s30 = scalar_lea.hbm %s3073_s1, %s1521_s27  ;;  %s1640_s16 = scalar_lea.hbm %s3073_s1, 256 }
  0x3a   : > { %s1635_s5 = scalar_lea.hbm %s1910_s30, 128  ;;  %p1641_p7 = scmp.lt.u32.totalorder %s1910_s30, %s3073_s1 }
  0x3b   : > { %p1636_p11 = scmp.ne.s32.totalorder %s1910_s30, %s1635_s5  ;;  %p1642_p10 = scmp.lt.u32.totalorder %s1640_s16, %s1635_s5 }
  0x3c   : > { %p1644_p3 = scmp.lt.u32.totalorder %s1635_s5, %s1910_s30 }
  0x3d   : > { %p1638_p13 = pnand %p1637_p12, %p1636_p11  ;;  %p1643_p6 = por %p1642_p10, %p1641_p7 }
  0x3f   : > { %p1639_p0 = pneg %p1638_p13  ;;  %p1645_p5 = por %p1644_p3, %p1643_p6 }
  0x41   : > { %p1646_p9 = pnand %p1645_p5, %p1639_p0 }
  0x43   : > { %1649 = shalt.err (!%p1646_p9)
}
  0x44   : > { %s1650_s23 = scalar_lea.vmem %s1912_s3, 128  ;;  %s1754_s27 = smov [#allocation10]  }
  0x45   : > { %p1651_p11 = scmp.ne.s32.totalorder %s1912_s3, %s1650_s23  ;;  %s1655_s28 = sshll.u32 %s1754_s27, 4  ;;  %s1656_s28 = int_to_ptr.vmem [resolvable:$false] %s1655_s28 }
  0x46   : > { %s1657_s29 = scalar_lea.vmem %s1656_s28, 256  ;;  %p1658_p1 = scmp.lt.s32.totalorder %s1912_s3, %s1656_s28 }
  0x47   : > { %p1653_p13 = pnand %p1651_p11, %p1637_p12  ;;  %p1659_p7 = scmp.lt.s32.totalorder %s1657_s29, %s1650_s23 }
  0x49   : > { %p1654_p4 = pneg %p1653_p13  ;;  %p1660_p10 = por %p1659_p7, %p1658_p1 }
  0x4b   : > { %p1661_p6 = pnand %p1660_p10, %p1654_p4 }
  0x4d   : > { %1664 = shalt.err (!%p1661_p6)
}
  0x4e   : > { %1538 = dma.hbm_to_vmem [thread:$0]  (!%p1916_p2), %s1910_s30, 128, %s1912_s3, %s134_s25  }
  0x4f   : > { %156 = sbr.rel (%p1841_p8) target bundleno = 617 (0x269), region = 28 }
  0x56   : > { %p3075_p9 = scmp.ne.s32.totalorder %s3059_s17, 0 }
  0x58   : > { %1718 = dma.done.wait (%p3075_p9), [#allocation9], 16  }
  0x59   : > { %1720 = vsyncadd (%p3075_p9), [#allocation9], 4294967280  ;;  %s1952_s18 = sand.u32 1, %s1735_s10   ;;  %p3077_p1 = scmp.ne.s32.totalorder %s3061_s19, 0 }
  0x5a   : > { %3076 = sst [smem:[#allocation25_spill]] %s1952_s18  ;;  %s1463_s5 = sshll.u32 %s1952_s18, 3 }
  0x5b   : > { %s163_s4 = scalar_lea.sflag [#allocation7], %s1952_s18  ;;  %s166_s6 = scalar_lea.vmem [#allocation10], %s1463_s5 }
  0x5c   : > { %1722 = dma.done.wait (%p3077_p1), %s163_s4, 128  }
  0x5d   : > { %1724 = vsyncadd (%p3077_p1), %s163_s4, 4294967168 }
  0x5e   : > { %171 = sfence }
  0x5f   : > { %vm245_vm0 = vcmask 162816   ;;  %v1755_v0 = vmov -inf   ;;  %v1756_v1 = vmov 0.0   ;;  %v196_v2 = vld [vmem:[%s166_s6] sm:$0xff]  ;;  %s1757_s17 = smov 114   ;;  %s1758_s19 = smov 2  }
  0x60   : > { %194 = vst [vmem:[#allocation3] sm:$0xff] %v1755_v0  ;;  %195 = vst [vmem:[#allocation3 + $0x8] sm:$0xff] %v1755_v0  ;;  %v200_v3 = vcombine.high %v196_v2, %v196_v2  ;;  %s1759_s21 = smov 82   ;;  %s1760_s30 = smov 98   ;;  %vm248_vm1 = vcmask 158720   ;;  %vm257_vm2 = vcmask 139280  }
  0x61   : > { %192 = vst [vmem:[#allocation2] sm:$0xff] %v1756_v1  ;;  %193 = vst [vmem:[#allocation2 + $0x8] sm:$0xff] %v1756_v1  ;;  %s1761_s3 = smov 50   ;;  %s1762_s25 = smov 66   ;;  %vm524_vm3 = vcmask 1046528   ;;  %vm930_vm4 = vcmask 1044480  }
  0x62   : > { %250 = vst.msk [vmem:[#allocation5] sm:$0xff] %vm245_vm0, %v1756_v1  ;;  %246 = vst.msk [vmem:[#allocation4] sm:$0xff] %vm245_vm0, %v1756_v1  ;;  %s1763_s7 = smov 18   ;;  %s1764_s16 = smov 34   ;;  %vm727_vm5 = vcmask 1045504   ;;  %vm1133_vm6 = vcmask 1043456  }
  0x63   : > { %247 = vst.msk [vmem:[#allocation4 + $0x8] sm:$0xff] %vm245_vm0, %v1756_v1  ;;  %251 = vst.msk [vmem:[#allocation5 + $0x8] sm:$0xff] %vm245_vm0, %v1756_v1  ;;  %s2018_s8 = sld [smem:[#allocation6 + $0x1a]]  ;;  %s2022_s24 = sld [smem:[#allocation6 + $0x1b]]  ;;  %vm1340_vm7 = vcmask 130048  }
  0x64   : > { %249 = vst.msk [vmem:[#allocation4 + $0x10] sm:$0xf] %vm248_vm1, %v1756_v1  ;;  %252 = vst.msk [vmem:[#allocation5 + $0x10] sm:$0xf] %vm248_vm1, %v1756_v1  ;;  %s2027_s23 = sld [smem:[#allocation6 + $0x1c]]  ;;  %s2031_s27 = sld [smem:[#allocation6 + $0x1]] }
  0x65   : > { %s2038_s28 = sld [smem:[#allocation6 + $0x2]]  ;;  %s2040_s29 = sld [smem:[#allocation6 + $0x3]] }
  0x66   : > { %s2043_s5 = sld [smem:[#allocation6 + $0x1d]]  ;;  %s2045_s4 = sld [smem:[#allocation6 + $0x4]] }
  0x67   : > { %v206_v4 = vld [vmem:[#allocation3] sm:$0xf]  ;;  %v207_v10 = vld [vmem:[#allocation3 + $0x8] sm:$0xf]  ;;  %s3009_s6 = smov 127   ;;  %s2071_s0 = sld [smem:[#allocation6 + $0x24]] }
  0x68   : > { %v197_v5 = vld [vmem:[#allocation2] sm:$0xf]  ;;  %v198_v6 = vld [vmem:[#allocation2 + $0x8] sm:$0xf]  ;;  %v208_v7 = vmax.f32 %v206_v4, %v196_v2  ;;  %v209_v11 = vmax.f32 %v207_v10, %v200_v3  ;;  %s2073_s1 = sld [smem:[#allocation6 + $0x25]]  ;;  %s2080_s22 = sld [smem:[#allocation6 + $0x26]] }
  0x69   : > { %v202_v8 = vadd.f32 %v197_v5, %v196_v2  ;;  %v203_v9 = vadd.f32 %v200_v3, %v198_v6  ;;  %v419_v0 = vstv %s2018_s8  ;;  %v447_v5 = vstv %s2022_s24  ;;  %s2082_s13 = sld [smem:[#allocation6 + $0x27]]  ;;  %s2087_s26 = sld [smem:[#allocation6 + $0x2a]] }
  0x6a   : > { %210 = vst [vmem:[#allocation3] sm:$0xf] %v208_v7  ;;  %211 = vst [vmem:[#allocation3 + $0x8] sm:$0xf] %v209_v11  ;;  %s3021_s11 = smov 125   ;;  %s2090_s10 = sld [smem:[#allocation6 + $0x2b]] }
  0x6b   : > { %204 = vst [vmem:[#allocation2] sm:$0xf] %v202_v8  ;;  %205 = vst [vmem:[#allocation2 + $0x8] sm:$0xf] %v203_v9  ;;  %v475_v9 = vstv %s2027_s23  ;;  %s2092_s14 = sld [smem:[#allocation6 + $0x2c]]  ;;  %s2094_s20 = sld [smem:[#allocation6 + $0x2e]] }
  0x6c   : > { %3078 = sst [smem:[#allocation26_spill]] %s2043_s5  ;;  %s2101_s9 = sld [smem:[#allocation6 + $0x5]] }
  0x6d   : > { %s2108_s2 = sld [smem:[#allocation6 + $0x2f]]  ;;  %s3029_s12 = smov 124  }
  0x6e   : > { %s2110_s15 = sld [smem:[#allocation6 + $0xf]]  ;;  %s2115_s18 = sld [smem:[#allocation6 + $0x30]] }
  0x6f   : > { %s2161_s8 = sld [smem:[#allocation6 + $0x23]]  ;;  %s2822_s24 = sld [smem:[#allocation6]] }
  0x70   : > { %s1508_s23 = sld [smem:[#allocation6 + $0x16]] }
  0x71   : > { %v231_v12 = vld [vmem:[#allocation3] sm:$0xff]  ;;  %v232_v34 = vld [vmem:[#allocation3 + $0x8] sm:$0xff] }
  0x72   : > { %v215_v13 = vld [vmem:[#allocation2] sm:$0xff]  ;;  %v233_v14 = vrot.slane %v231_v12, 4  ;;  %v216_v20 = vld [vmem:[#allocation2 + $0x8] sm:$0xff]  ;;  %v239_v36 = vrot.slane %v232_v34, 4 }
  0x73   : > { %v217_v15 = vrot.slane %v215_v13, 4  ;;  %v223_v25 = vrot.slane %v216_v20, 4 }
  0x74   : > { %v234_v16 = vmax.f32 %v231_v12, %v233_v14  ;;  %v240_v37 = vmax.f32 %v232_v34, %v239_v36  ;;  %v2168_v36 = vstv %s2073_s1 }
  0x75   : > { %v218_v17 = vadd.f32 %v217_v15, %v215_v13  ;;  %v224_v28 = vadd.f32 %v223_v25, %v216_v20  ;;  %v503_v13 = vstv %s2043_s5  ;;  %v461_v20 = vstv %s2040_s29  ;;  %s2117_s5 = sld [smem:[#allocation6 + $0x14]]  ;;  %s3149_s29 = sld [smem:[#allocation25_spill]] }
  0x76   : > { %v235_v18 = vrot.slane %v234_v16, 2  ;;  %v241_v38 = vrot.slane %v240_v37, 2 }
  0x77   : > { %v219_v19 = vrot.slane %v218_v17, 2  ;;  %v225_v30 = vrot.slane %v224_v28, 2 }
  0x78   : > { %v236_v21 = vmax.f32 %v234_v16, %v235_v18  ;;  %v242_v39 = vmax.f32 %v240_v37, %v241_v38  ;;  %v405_v18 = vstv %s2031_s27  ;;  %v2171_v37 = vstv %s2080_s22  ;;  %s1500_s22 = sld [smem:[#allocation6 + $0x12]]  ;;  %s1510_s27 = sld [smem:[#allocation6 + $0x17]] }
  0x79   : > { %v220_v22 = vadd.f32 %v219_v19, %v218_v17  ;;  %v226_v31 = vadd.f32 %v225_v30, %v224_v28  ;;  %v433_v19 = vstv %s2038_s28  ;;  %v2176_v38 = vstv %s2082_s13  ;;  %s1492_s13 = sld [smem:[#allocation6 + $0xe]]  ;;  %s1512_s28 = sld [smem:[#allocation6 + $0x18]] }
  0x7a   : > { %v237_v23 = vrot.slane %v236_v21, 1  ;;  %v243_v40 = vrot.slane %v242_v39, 1 }
  0x7b   : > { %v221_v24 = vrot.slane %v220_v22, 1  ;;  %v227_v32 = vrot.slane %v226_v31, 1 }
  0x7c   : > { %v238_v26 = vmax.f32 %v236_v21, %v237_v23  ;;  %v244_v41 = vmax.f32 %v242_v39, %v243_v40  ;;  %v2182_v40 = vstv %s2087_s26  ;;  %s1506_s26 = sld [smem:[#allocation6 + $0x15]] }
  0x7d   : > { %v222_v27 = vadd.f32 %v221_v24, %v220_v22  ;;  %v228_v33 = vadd.f32 %v227_v32, %v226_v31  ;;  %v489_v24 = vstv %s2045_s4  ;;  %3084 = vst [vmem:[#allocation31_spill] sm:$0xff] %v2182_v40  ;;  %s1464_s4 = sshll.u32 %s3149_s29, 4 }
  0x7e   : > { %268 = vrot.lane.b32.xlu1 %v238_v26, %s1757_s17  ;;  %260 = vrot.lane.b32.xlu0 %v238_v26, %s1758_s19 }
  0x7f   : > { %v229_v29 = vmul.f32 0.25, %v222_v27  ;;  %v230_v35 = vmul.f32 0.25, %v228_v33 }
  0x82   : > { %284 = vrot.lane.b32.xlu1 %v238_v26, %s1759_s21  ;;  %276 = vrot.lane.b32.xlu0 %v238_v26, %s1760_s30 }
  0x86   : > { %272 = vrot.lane.b32.xlu1 %v229_v29, %s1760_s30  ;;  %254 = vrot.lane.b32.xlu0 %v229_v29, %s1758_s19 }
  0x8a   : > { %280 = vrot.lane.b32.xlu1 %v229_v29, %s1759_s21  ;;  %264 = vrot.lane.b32.xlu0 %v229_v29, %s1757_s17 }
  0x8e   : > { %296 = vrot.lane.b32.xlu1 %v229_v29, %s1761_s3  ;;  %288 = vrot.lane.b32.xlu0 %v229_v29, %s1762_s25 }
  0x92   : > { %312 = vrot.lane.b32.xlu1 %v229_v29, %s1763_s7  ;;  %304 = vrot.lane.b32.xlu0 %v229_v29, %s1764_s16 }
  0x96   : > { %330 = vrot.lane.b32.xlu1 %v230_v35, %s1757_s17  ;;  %321 = vrot.lane.b32.xlu0 %v230_v35, %s1758_s19 }
  0x9a   : > { %346 = vrot.lane.b32.xlu1 %v230_v35, %s1759_s21  ;;  %338 = vrot.lane.b32.xlu0 %v230_v35, %s1760_s30 }
  0x9e   : > { %362 = vrot.lane.b32.xlu1 %v230_v35, %s1761_s3  ;;  %354 = vrot.lane.b32.xlu0 %v230_v35, %s1762_s25 }
  0xa2   : > { %300 = vrot.lane.b32.xlu1 %v238_v26, %s1761_s3  ;;  %292 = vrot.lane.b32.xlu0 %v238_v26, %s1762_s25 }
  0xa6   : > { %316 = vrot.lane.b32.xlu1 %v238_v26, %s1763_s7  ;;  %308 = vrot.lane.b32.xlu0 %v238_v26, %s1764_s16 }
  0xaa   : > { %334 = vrot.lane.b32.xlu1 %v244_v41, %s1757_s17  ;;  %326 = vrot.lane.b32.xlu0 %v244_v41, %s1758_s19  ;;  %s2048_s17 = sld [smem:[#allocation6 + $0x6]]  ;;  %s2050_s19 = sld [smem:[#allocation6 + $0x7]] }
  0xae   : > { %350 = vrot.lane.b32.xlu1 %v244_v41, %s1759_s21  ;;  %342 = vrot.lane.b32.xlu0 %v244_v41, %s1760_s30  ;;  %s2052_s21 = sld [smem:[#allocation6 + $0x8]]  ;;  %s2059_s30 = sld [smem:[#allocation6 + $0x1f]] }
  0xb0   : > { %v2123_v25 = vstv %s2048_s17  ;;  %v2126_v26 = vstv %s2050_s19  ;;  %s2147_s17 = sld [smem:[#allocation6 + $0x1e]]  ;;  %s2163_s19 = sld [smem:[#allocation6 + $0x28]] }
  0xb1   : > { %3079 = vst [vmem:[#allocation27_spill] sm:$0xff] %v2123_v25  ;;  %3080 = vst [vmem:[#allocation28_spill] sm:$0xff] %v2126_v26 }
  0xb2   : > { %366 = vrot.lane.b32.xlu1 %v244_v41, %s1761_s3  ;;  %358 = vrot.lane.b32.xlu0 %v244_v41, %s1762_s25  ;;  %s2061_s3 = sld [smem:[#allocation6 + $0x9]]  ;;  %s2064_s25 = sld [smem:[#allocation6 + $0x20]] }
  0xb4   : > { %v2129_v27 = vstv %s2052_s21  ;;  %v2142_v30 = vstv %s2059_s30  ;;  %s3082_s21 = smov 127   ;;  %s3151_s30 = sld [smem:[#allocation23_spill]] }
  0xb5   : > { %3081 = vst [vmem:[#allocation29_spill] sm:$0xff] %v2129_v27 }
  0xb6   : > { %378 = vrot.lane.b32.xlu1 %v230_v35, %s1763_s7  ;;  %370 = vrot.lane.b32.xlu0 %v230_v35, %s1764_s16  ;;  %v2159_v35 = vstv %s2071_s0  ;;  %s3088_s0 = smov 126  }
  0xb8   : > { %v2145_v31 = vstv %s2061_s3  ;;  %v2150_v32 = vstv %s2064_s25  ;;  %s187_s3 = scalar_lea.vmem [#allocation11], %s1464_s4 }
  0xba   : > { %382 = vrot.lane.b32.xlu1 %v244_v41, %s1763_s7  ;;  %374 = vrot.lane.b32.xlu0 %v244_v41, %s1764_s16  ;;  %s2066_s7 = sld [smem:[#allocation6 + $0x21]]  ;;  %s3013_s16 = smov 126   ;;  %v2185_v41 = vstv %s2090_s10 }
  0xbb   : > { %3085 = vst [vmem:[#allocation32_spill] sm:$0xff] %v2185_v41  ;;  %s2624_s10 = sld [smem:[#allocation6 + $0xb]]  ;;  %p3153_p8 = scmp.ne.s32.totalorder %s3151_s30, 0 }
  0xc0   : > { %v2153_v33 = vstv %s2066_s7  ;;  %s1357_s7 = sshll.u32 %s187_s3, 4  ;;  %s2953_s7 = int_to_ptr.vmem [resolvable:$true] %s1357_s7 }
  0xf0   : > { %v269_v42 = vpop.permute.xlu1 %268  ;;  %v261_v43 = vpop.permute.xlu0 %260 }
  0xf1   : > { %271 = vst.msk [vmem:[#allocation5 + $0x3] sm:$0x1] %vm257_vm2, %v269_v42  ;;  %263 = vst.msk [vmem:[#allocation5 + $0x2] sm:$0x1] %vm257_vm2, %v261_v43 }
  0xf4   : > { %v285_v44 = vpop.permute.xlu1 %284  ;;  %v277_v45 = vpop.permute.xlu0 %276 }
  0xf5   : > { %287 = vst.msk [vmem:[#allocation5 + $0x5] sm:$0x1] %vm257_vm2, %v285_v44  ;;  %279 = vst.msk [vmem:[#allocation5 + $0x4] sm:$0x1] %vm257_vm2, %v277_v45  ;;  %v2194_v44 = vstv %s2092_s14  ;;  %v2197_v45 = vstv %s2101_s9  ;;  %s3093_s9 = smov 124   ;;  %s1496_s14 = sld [smem:[#allocation6 + $0x10]] }
  0xf6   : > { %3086 = vst [vmem:[#allocation33_spill] sm:$0xff] %v2194_v44 }
  0xf8   : > { %v273_v46 = vpop.permute.xlu1 %272  ;;  %v255_v47 = vpop.permute.xlu0 %254 }
  0xf9   : > { %275 = vst.msk [vmem:[#allocation4 + $0x4] sm:$0x1] %vm257_vm2, %v273_v46  ;;  %258 = vst.msk [vmem:[#allocation4 + $0x2] sm:$0x1] %vm257_vm2, %v255_v47  ;;  %v2200_v46 = vstv %s2094_s20  ;;  %v2203_v47 = vstv %s2108_s2  ;;  %s3090_s2 = smov 125   ;;  %s1498_s20 = sld [smem:[#allocation6 + $0x11]] }
  0xfa   : > { %3087 = vst [vmem:[#allocation34_spill] sm:$0xff] %v2203_v47 }
  0xfc   : > { %v281_v48 = vpop.permute.xlu1 %280  ;;  %v265_v49 = vpop.permute.xlu0 %264 }
  0xfd   : > { %283 = vst.msk [vmem:[#allocation4 + $0x5] sm:$0x1] %vm257_vm2, %v281_v48  ;;  %267 = vst.msk [vmem:[#allocation4 + $0x3] sm:$0x1] %vm257_vm2, %v265_v49  ;;  %v2209_v49 = vstv %s2110_s15  ;;  %s1502_s15 = sld [smem:[#allocation6 + $0x13]] }
 0x100   : > { %v297_v50 = vpop.permute.xlu1 %296  ;;  %v289_v51 = vpop.permute.xlu0 %288 }
 0x101   : > { %299 = vst.msk [vmem:[#allocation4 + $0x7] sm:$0x1] %vm257_vm2, %v297_v50  ;;  %291 = vst.msk [vmem:[#allocation4 + $0x6] sm:$0x1] %vm257_vm2, %v289_v51  ;;  %v2214_v50 = vstv %s2115_s18  ;;  %v2217_v51 = vstv %s2117_s5  ;;  %s2816_s18 = sld [smem:[#allocation6 + $0x19]]  ;;  %s3150_s5 = sld [smem:[#allocation18_spill]] }
 0x104   : > { %v313_v52 = vpop.permute.xlu1 %312  ;;  %v305_v53 = vpop.permute.xlu0 %304 }
 0x105   : > { %315 = vst.msk [vmem:[#allocation4 + $0x9] sm:$0x1] %vm257_vm2, %v313_v52  ;;  %307 = vst.msk [vmem:[#allocation4 + $0x8] sm:$0x1] %vm257_vm2, %v305_v53 }
 0x107   : > { %s1522_s25 = sshll.u32 %s3150_s5, 8 }
 0x108   : > { %v331_v54 = vpop.permute.xlu1 %330  ;;  %v322_v55 = vpop.permute.xlu0 %321  ;;  %v2105_v17 = vld [vmem:[#allocation4] sm:$0xff] }
 0x109   : > { %333 = vst.msk [vmem:[#allocation4 + $0xb] sm:$0x1] %vm257_vm2, %v331_v54  ;;  %324 = vst.msk [vmem:[#allocation4 + $0xa] sm:$0x1] %vm257_vm2, %v322_v55  ;;  %v406_v28 = vmul.f32 %v405_v18, %v2105_v17  ;;  %v434_v42 = vmul.f32 %v433_v19, %v2105_v17  ;;  %v2221_v52 = vmul.f32 %v2123_v25, %v2105_v17 }
 0x10a   : > { %v2225_v53 = vmul.f32 %v2126_v26, %v2105_v17  ;;  %v2232_v55 = vmul.f32 %v2197_v45, %v2105_v17 }
 0x10c   : > { %v347_v56 = vpop.permute.xlu1 %346  ;;  %v339_v57 = vpop.permute.xlu0 %338 }
 0x10d   : > { %349 = vst.msk [vmem:[#allocation4 + $0xd] sm:$0x1] %vm257_vm2, %v347_v56  ;;  %341 = vst.msk [vmem:[#allocation4 + $0xc] sm:$0x1] %vm257_vm2, %v339_v57  ;;  %v462_v56 = vmul.f32 %v461_v20, %v2105_v17 }
 0x110   : > { %v363_v58 = vpop.permute.xlu1 %362  ;;  %v355_v59 = vpop.permute.xlu0 %354 }
 0x111   : > { %365 = vst.msk [vmem:[#allocation4 + $0xf] sm:$0x1] %vm257_vm2, %v363_v58  ;;  %357 = vst.msk [vmem:[#allocation4 + $0xe] sm:$0x1] %vm257_vm2, %v355_v59  ;;  %v2246_v59 = vmul.f32 %v2209_v49, %v2105_v17 }
 0x114   : > { %v301_v60 = vpop.permute.xlu1 %300  ;;  %v293_v61 = vpop.permute.xlu0 %292 }
 0x115   : > { %303 = vst.msk [vmem:[#allocation5 + $0x7] sm:$0x1] %vm257_vm2, %v301_v60  ;;  %295 = vst.msk [vmem:[#allocation5 + $0x6] sm:$0x1] %vm257_vm2, %v293_v61 }
 0x118   : > { %v317_v62 = vpop.permute.xlu1 %316  ;;  %v309_v63 = vpop.permute.xlu0 %308  ;;  %v2248_v60 = vld [vmem:[#allocation4 + $0x8] sm:$0xff] }
 0x119   : > { %319 = vst.msk [vmem:[#allocation5 + $0x9] sm:$0x1] %vm257_vm2, %v317_v62  ;;  %311 = vst.msk [vmem:[#allocation5 + $0x8] sm:$0x1] %vm257_vm2, %v309_v63  ;;  %v2255_v62 = vstv %s2147_s17  ;;  %v2258_v63 = vstv %s2161_s8  ;;  %s3152_s8 = sld [smem:[#allocation43_spill]] }
 0x11c   : > { %v2029_v1 = vld [vmem:[#allocation5] sm:$0xff]  ;;  %v335_v2 = vpop.permute.xlu1 %334  ;;  %v327_v3 = vpop.permute.xlu0 %326 }
 0x11d   : > { %337 = vst.msk [vmem:[#allocation5 + $0xb] sm:$0x1] %vm257_vm2, %v335_v2  ;;  %329 = vst.msk [vmem:[#allocation5 + $0xa] sm:$0x1] %vm257_vm2, %v327_v3  ;;  %v420_v4 = vmul.f32 %v419_v0, %v2029_v1  ;;  %v448_v8 = vmul.f32 %v447_v5, %v2029_v1  ;;  %v476_v12 = vmul.f32 %v475_v9, %v2029_v1 }
 0x11e   : > { %v504_v16 = vmul.f32 %v503_v13, %v2029_v1  ;;  %v490_v2 = vmul.f32 %v489_v24, %v2105_v17  ;;  %v2270_v3 = vmul.f32 %v2129_v27, %v2105_v17 }
 0x11f   : > { %424 = vrot.lane.b32.xlu0 %v420_v4, %s3009_s6  ;;  %s2069_s6 = sld [smem:[#allocation6 + $0x22]]  ;;  %v2274_v4 = vmul.f32 %v2217_v51, %v2105_v17 }
 0x120   : > { %v351_v6 = vpop.permute.xlu1 %350  ;;  %v343_v7 = vpop.permute.xlu0 %342  ;;  %3091 = vst [vmem:[#allocation35_spill] sm:$0xff] %v2270_v3 }
 0x121   : > { %353 = vst.msk [vmem:[#allocation5 + $0xd] sm:$0x1] %vm257_vm2, %v351_v6  ;;  %345 = vst.msk [vmem:[#allocation5 + $0xc] sm:$0x1] %vm257_vm2, %v343_v7  ;;  %v574_v6 = vmul.f32 %v2142_v30, %v2029_v1  ;;  %v559_v7 = vrot.slane %v2221_v52, 1 }
 0x123   : > { %452 = vrot.lane.b32.xlu0 %v448_v8, %s3013_s16  ;;  %s2085_s16 = sld [smem:[#allocation6 + $0x29]] }
 0x124   : > { %v367_v10 = vpop.permute.xlu1 %366  ;;  %v359_v11 = vpop.permute.xlu0 %358 }
 0x125   : > { %369 = vst.msk [vmem:[#allocation5 + $0xf] sm:$0x1] %vm257_vm2, %v367_v10  ;;  %361 = vst.msk [vmem:[#allocation5 + $0xe] sm:$0x1] %vm257_vm2, %v359_v11  ;;  %v2156_v34 = vstv %s2069_s6  ;;  %s2173_s6 = sld [smem:[#allocation6 + $0x2d]]  ;;  %v407_v11 = vmul.f32 %v405_v18, %v2248_v60  ;;  %v463_v18 = vmul.f32 %v461_v20, %v2248_v60  ;;  %v2325_v20 = vmul.f32 %v489_v24, %v2248_v60 }
 0x126   : > { %v700_v52 = vmul.f32 %v2156_v34, %v2029_v1 }
 0x127   : > { %480 = vrot.lane.b32.xlu0 %v476_v12, %s3021_s11  ;;  %s2103_s11 = sld [smem:[#allocation6 + $0xa]]  ;;  %v2356_v12 = vmul.f32 %v2171_v37, %v2029_v1 }
 0x128   : > { %v379_v14 = vpop.permute.xlu1 %378  ;;  %v371_v15 = vpop.permute.xlu0 %370 }
 0x129   : > { %381 = vst.msk [vmem:[#allocation4 + $0x11] sm:$0x1] %vm257_vm2, %v379_v14  ;;  %373 = vst.msk [vmem:[#allocation4 + $0x10] sm:$0x1] %vm257_vm2, %v371_v15  ;;  %v2179_v39 = vstv %s2085_s16 }
 0x12a   : > { %3083 = vst [vmem:[#allocation30_spill] sm:$0xff] %v2179_v39 }
 0x12b   : > { %508 = vrot.lane.b32.xlu0 %v504_v16, %s3029_s12  ;;  %s2131_s12 = sld [smem:[#allocation6 + $0x31]] }
 0x12c   : > { %v2119_v21 = vld [vmem:[#allocation5 + $0x8] sm:$0xff]  ;;  %v383_v22 = vpop.permute.xlu1 %382  ;;  %v375_v23 = vpop.permute.xlu0 %374 }
 0x12d   : > { %385 = vst.msk [vmem:[#allocation5 + $0x11] sm:$0x1] %vm257_vm2, %v383_v22  ;;  %377 = vst.msk [vmem:[#allocation5 + $0x10] sm:$0x1] %vm257_vm2, %v375_v23  ;;  %v421_v29 = vmul.f32 %v419_v0, %v2119_v21  ;;  %v449_v43 = vmul.f32 %v447_v5, %v2119_v21  ;;  %v2206_v48 = vstv %s2103_s11  ;;  %v477_v57 = vmul.f32 %v475_v9, %v2119_v21  ;;  %s2655_s11 = sld [smem:[#allocation6 + $0xc]] }
 0x12e   : > { %v2242_v58 = vmul.f32 %v2206_v48, %v2105_v17  ;;  %v2252_v61 = vmul.f32 %v2142_v30, %v2119_v21  ;;  %v2261_v0 = vstv %s2163_s19  ;;  %v2277_v5 = vstv %s2173_s6  ;;  %s2951_s19 = scalar_lea.hbm %s3152_s8, %s1522_s25  ;;  %s1665_s6 = scalar_lea.vmem %s2953_s7, 256 }
 0x12f   : > { %410 = vrot.lane.b32.xlu0 %v406_v28, %s3082_s21  ;;  %426 = vrot.lane.b32.xlu1 %v421_v29, %s3082_s21  ;;  %v505_v10 = vmul.f32 %v503_v13, %v2119_v21  ;;  %v2295_v16 = vmul.f32 %v2150_v32, %v2119_v21  ;;  %v435_v22 = vmul.f32 %v433_v19, %v2248_v60  ;;  %v580_v29 = vrot.slane %v574_v6, 1  ;;  %p1666_p4 = scmp.ne.s32.totalorder %s2953_s7, %s1665_s6 }
 0x130   : > { %v3031_v15 = vrot.slane %v2252_v61, 1  ;;  %v2302_v13 = vmul.f32 %v2123_v25, %v2248_v60  ;;  %v2311_v23 = vmul.f32 %v2126_v26, %v2248_v60  ;;  %v2315_v28 = vmul.f32 %v2129_v27, %v2248_v60 }
 0x131   : > { %v2228_v54 = vstv %s2131_s12  ;;  %v2366_v6 = vmul.f32 %v2156_v34, %v2119_v21  ;;  %v2374_v27 = vmul.f32 %v2159_v35, %v2119_v21  ;;  %v2431_v3 = vmul.f32 %v2194_v44, %v2119_v21  ;;  %s1490_s12 = sld [smem:[#allocation6 + $0xd]]  ;;  %p1667_p2 = pnand %p1666_p4, %p3153_p8 }
 0x132   : > { %3092 = vst [vmem:[#allocation36_spill] sm:$0xff] %v2302_v13  ;;  %3094 = vst [vmem:[#allocation37_spill] sm:$0xff] %v2315_v28  ;;  %v582_v24 = vsel %vm524_vm3, %v580_v29, %v3031_v15  ;;  %v2360_v29 = vmul.f32 %v2176_v38, %v2029_v1  ;;  %v3098_v25 = vrot.slane %v2302_v13, 1 }
 0x133   : > { %438 = vrot.lane.b32.xlu0 %v434_v42, %s3088_s0  ;;  %454 = vrot.lane.b32.xlu1 %v449_v43, %s3088_s0  ;;  %v616_v42 = vmul.f32 %v2150_v32, %v2029_v1  ;;  %v658_v43 = vmul.f32 %v2153_v33, %v2029_v1  ;;  %p1668_p12 = pneg %p1667_p2 }
 0x134   : > { %v2350_v14 = vld [vmem:[#allocation5 + $0x10] sm:$0xf]  ;;  %v2385_v28 = vsel %vm524_vm3, %v559_v7, %v3098_v25  ;;  %v2402_v25 = vmul.f32 %v2185_v41, %v2119_v21 }
 0x135   : > { %v622_v8 = vrot.slane %v616_v42, 1  ;;  %v664_v19 = vrot.slane %v658_v43, 1  ;;  %v3097_v42 = vrot.slane %v2295_v16, 1  ;;  %v1066_v13 = vmul.f32 %v2185_v41, %v2350_v14 }
 0x137   : > { %466 = vrot.lane.b32.xlu0 %v462_v56, %s3090_s2  ;;  %482 = vrot.lane.b32.xlu1 %v477_v57, %s3090_s2  ;;  %v2331_v56 = vmul.f32 %v2159_v35, %v2029_v1  ;;  %v2335_v57 = vmul.f32 %v2168_v36, %v2029_v1  ;;  %v624_v43 = vsel %vm524_vm3, %v622_v8, %v3097_v42  ;;  %v867_v8 = vrot.slane %v2356_v12, 2 }
 0x138   : > { %v2407_v42 = vmul.f32 %v2171_v37, %v2119_v21  ;;  %v2413_v12 = vmul.f32 %v2176_v38, %v2119_v21 }
 0x139   : > { %v783_v26 = vrot.slane %v2331_v56, 2  ;;  %v825_v9 = vrot.slane %v2335_v57, 2  ;;  %v2393_v56 = vmul.f32 %v2168_v36, %v2119_v21  ;;  %v2398_v57 = vmul.f32 %v2182_v40, %v2119_v21 }
 0x13a   : > { %v3045_v41 = vrot.slane %v2413_v12, 2 }
 0x13b   : > { %494 = vrot.lane.b32.xlu0 %v490_v2, %s3093_s9  ;;  %510 = vrot.lane.b32.xlu1 %v505_v10, %s3093_s9  ;;  %v2339_v2 = vmul.f32 %v2145_v31, %v2248_v60  ;;  %v2347_v10 = vmul.f32 %v2153_v33, %v2119_v21 }
 0x13d   : > { %3095 = vst [vmem:[#allocation38_spill] sm:$0xff] %v2339_v2  ;;  %v3099_v7 = vrot.slane %v2347_v10, 1 }
 0x13f   : > { %585 = vrot.lane.b32.xlu0 %v582_v24, %s3082_s21  ;;  %412 = vrot.lane.b32.xlu1 %v407_v11, %s3082_s21  ;;  %v2370_v11 = vmul.f32 %v2179_v39, %v2119_v21  ;;  %v706_v24 = vrot.slane %v700_v52, 1  ;;  %v982_v52 = vmul.f32 %v2179_v39, %v2350_v14  ;;  %v1024_v39 = vmul.f32 %v2182_v40, %v2350_v14 }
 0x140   : > { %v666_v2 = vsel %vm524_vm3, %v664_v19, %v3099_v7  ;;  %v3043_v19 = vrot.slane %v2402_v25, 3  ;;  %v1073_v40 = vrot.slane %v1066_v13, 3 }
 0x141   : > { %3096 = vst [vmem:[#allocation39_spill] sm:$0xff] %v2370_v11  ;;  %v1031_v7 = vrot.slane %v1024_v39, 3  ;;  %v3102_v39 = vrot.slane %v2398_v57, 3 }
 0x143   : > { %627 = vrot.lane.b32.xlu0 %v624_v43, %s3088_s0  ;;  %440 = vrot.lane.b32.xlu1 %v435_v22, %s3088_s0  ;;  %v989_v43 = vrot.slane %v982_v52, 3  ;;  %v576_v22 = vmul.f32 %v2142_v30, %v2350_v14  ;;  %v3100_v52 = vrot.slane %v2370_v11, 3  ;;  %v3101_v30 = vrot.slane %v2366_v6, 1 }
 0x144   : > { %v2450_v13 = vsel %vm930_vm4, %v3102_v39, %v1031_v7  ;;  %v909_v39 = vrot.slane %v2360_v29, 2  ;;  %v702_v29 = vmul.f32 %v2156_v34, %v2350_v14  ;;  %v1185_v34 = vmul.f32 %v2200_v46, %v2350_v14 }
 0x145   : > { %v2427_v15 = vsel %vm930_vm4, %v3100_v52, %v989_v43  ;;  %v708_v11 = vsel %vm524_vm3, %v706_v24, %v3101_v30  ;;  %v2455_v24 = vsel %vm930_vm4, %v3043_v19, %v1073_v40  ;;  %v583_v30 = vrot.slane %v576_v22, 1 }
 0x146   : > { %v660_v52 = vmul.f32 %v2153_v33, %v2350_v14  ;;  %v3044_v43 = vrot.slane %v2431_v3, 3  ;;  %v3104_v40 = vrot.slane %v2311_v23, 1  ;;  %v3105_v22 = vrot.slane %v2225_v53, 1 }
 0x147   : > { %669 = vrot.lane.b32.xlu0 %v666_v2, %s3090_s2  ;;  %468 = vrot.lane.b32.xlu1 %v463_v18, %s3090_s2  ;;  %v1108_v2 = vmul.f32 %v2194_v44, %v2350_v14  ;;  %v618_v18 = vmul.f32 %v2150_v32, %v2350_v14  ;;  %v3103_v32 = vrot.slane %v2374_v27, 2  ;;  %v3107_v19 = vrot.slane %v2407_v42, 2 }
 0x148   : > { %v2472_v33 = vsel %vm524_vm3, %v3105_v22, %v3104_v40  ;;  %v2500_v40 = vmul.f32 %v2203_v47, %v2119_v21  ;;  %v667_v22 = vrot.slane %v660_v52, 1  ;;  %v2522_v52 = vmul.f32 %v2171_v37, %v2350_v14 }
 0x149   : > { %v1115_v44 = vrot.slane %v1108_v2, 3  ;;  %v785_v7 = vsel %vm727_vm5, %v783_v26, %v3103_v32  ;;  %v2476_v2 = vmul.f32 %v2200_v46, %v2119_v21  ;;  %v869_v26 = vsel %vm727_vm5, %v867_v8, %v3107_v19 }
 0x14a   : > { %v2494_v32 = vsel %vm727_vm5, %v909_v39, %v3045_v41  ;;  %v3109_v8 = vrot.slane %v2252_v61, 1  ;;  %v625_v19 = vrot.slane %v618_v18, 1  ;;  %v2509_v39 = vmul.f32 %v2168_v36, %v2350_v14 }
 0x14b   : > { %711 = vrot.lane.b32.xlu0 %v708_v11, %s3093_s9  ;;  %496 = vrot.lane.b32.xlu1 %v2325_v20, %s3093_s9  ;;  %v3106_v11 = vrot.slane %v2393_v56, 2  ;;  %v2489_v53 = vsel %vm930_vm4, %v3044_v43, %v1115_v44  ;;  %v1192_v43 = vrot.slane %v1185_v34, 4  ;;  %v1227_v61 = vmul.f32 %v2203_v47, %v2350_v14 }
 0x14c   : > { %3108 = vst [vmem:[#allocation40_spill] sm:$0xff] %v2489_v53  ;;  %v584_v44 = vsel %vm524_vm3, %v3109_v8, %v583_v30  ;;  %v709_v18 = vrot.slane %v702_v29, 1  ;;  %v2526_v36 = vmul.f32 %v2176_v38, %v2350_v14  ;;  %v2530_v30 = vmul.f32 %v2228_v54, %v2119_v21  ;;  %v2540_v8 = vld [vmem:[#allocation4 + $0x10] sm:$0xf] }
 0x14d   : > { %v827_v20 = vsel %vm727_vm5, %v825_v9, %v3106_v11  ;;  %v779_v9 = vmul.f32 %v2159_v35, %v2350_v14  ;;  %v3047_v35 = vrot.slane %v2476_v2, 4  ;;  %v2516_v11 = vmul.f32 %v2214_v50, %v2119_v21 }
 0x14e   : > { %v1234_v29 = vrot.slane %v1227_v61, 4  ;;  %v1269_v37 = vmul.f32 %v2214_v50, %v2350_v14  ;;  %v3110_v38 = vrot.slane %v2295_v16, 1  ;;  %v3111_v41 = vrot.slane %v2347_v10, 1 }
 0x14f   : > { %788 = vrot.lane.b32.xlu0 %v785_v7, %s3082_s21  ;;  %587 = vrot.lane.b32.xlu1 %v584_v44, %s3082_s21  ;;  %v2536_v34 = vsel %vm1133_vm6, %v3047_v35, %v1192_v43  ;;  %v786_v7 = vrot.slane %v779_v9, 2  ;;  %v3049_v43 = vrot.slane %v2516_v11, 4  ;;  %v3112_v61 = vrot.slane %v2500_v40, 4 }
 0x150   : > { %v626_v44 = vsel %vm524_vm3, %v3110_v38, %v625_v19  ;;  %v668_v53 = vsel %vm524_vm3, %v3111_v41, %v667_v22  ;;  %v1276_v16 = vrot.slane %v1269_v37, 4  ;;  %v1311_v10 = vmul.f32 %v2228_v54, %v2350_v14 }
 0x151   : > { %v2555_v35 = vsel %vm1133_vm6, %v3112_v61, %v1234_v29  ;;  %v3113_v41 = vrot.slane %v2366_v6, 1  ;;  %v3048_v19 = vrot.slane %v2530_v30, 4  ;;  %v536_v22 = vmul.f32 %v2255_v62, %v2029_v1 }
 0x152   : > { %v2570_v29 = vsel %vm1133_vm6, %v3049_v43, %v1276_v16  ;;  %v1318_v37 = vrot.slane %v1311_v10, 4  ;;  %v537_v38 = vmul.f32 %v2255_v62, %v2119_v21  ;;  %v520_v6 = vmul.f32 %v2197_v45, %v2540_v8 }
 0x153   : > { %830 = vrot.lane.b32.xlu0 %v827_v20, %s3088_s0  ;;  %629 = vrot.lane.b32.xlu1 %v626_v44, %s3088_s0  ;;  %v710_v9 = vsel %vm524_vm3, %v3113_v41, %v709_v18  ;;  %v519_v20 = vmul.f32 %v2197_v45, %v2248_v60  ;;  %v3114_v18 = vrot.slane %v2374_v27, 2  ;;  %v542_v41 = vrot.slane %v536_v22, 1 }
 0x154   : > { %v538_v47 = vmul.f32 %v2255_v62, %v2350_v14  ;;  %v2586_v16 = vsel %vm1133_vm6, %v3048_v19, %v1318_v37  ;;  %v543_v10 = vrot.slane %v537_v38, 1  ;;  %v528_v45 = vrot.slane %v520_v6, 1 }
 0x155   : > { %v787_v44 = vsel %vm727_vm5, %v3114_v18, %v786_v7  ;;  %v526_v61 = vrot.slane %v519_v20, 1  ;;  %v722_v27 = vmul.f32 %v2206_v48, %v2248_v60  ;;  %v3115_v7 = vrot.slane %v2232_v55, 1 }
 0x156   : > { %v545_v62 = vrot.slane %v538_v47, 1  ;;  %v2600_v22 = vsel %vm524_vm3, %v542_v41, %v543_v10  ;;  %v723_v55 = vmul.f32 %v2206_v48, %v2540_v8  ;;  %v925_v48 = vmul.f32 %v2209_v49, %v2248_v60 }
 0x157   : > { %872 = vrot.lane.b32.xlu0 %v869_v26, %s3090_s2  ;;  %671 = vrot.lane.b32.xlu1 %v668_v53, %s3090_s2  ;;  %v2593_v20 = vsel %vm524_vm3, %v3115_v7, %v526_v61  ;;  %v739_v26 = vmul.f32 %v2258_v63, %v2029_v1  ;;  %v740_v53 = vmul.f32 %v2258_v63, %v2119_v21  ;;  %v729_v38 = vrot.slane %v722_v27, 2 }
 0x158   : > { %v2603_v37 = vsel %vm524_vm3, %v526_v61, %v528_v45  ;;  %v2608_v6 = vsel %vm524_vm3, %v543_v10, %v545_v62  ;;  %v741_v7 = vmul.f32 %v2258_v63, %v2350_v14  ;;  %v3116_v61 = vrot.slane %v2242_v58, 2 }
 0x159   : > { %v745_v47 = vrot.slane %v739_v26, 2  ;;  %v746_v18 = vrot.slane %v740_v53, 2  ;;  %v731_v45 = vrot.slane %v723_v55, 2  ;;  %v942_v10 = vmul.f32 %v2261_v0, %v2029_v1 }
 0x15a   : > { %v2618_v41 = vsel %vm727_vm5, %v3116_v61, %v729_v38  ;;  %v926_v58 = vmul.f32 %v2209_v49, %v2540_v8  ;;  %v932_v62 = vrot.slane %v925_v48, 3  ;;  %v944_v53 = vmul.f32 %v2261_v0, %v2350_v14 }
 0x15b   : > { %914 = vrot.lane.b32.xlu0 %v2494_v32, %s3093_s9  ;;  %713 = vrot.lane.b32.xlu1 %v710_v9, %s3093_s9  ;;  %v2627_v63 = vsel %vm727_vm5, %v745_v47, %v746_v18  ;;  %v748_v32 = vrot.slane %v741_v7, 2  ;;  %v943_v9 = vmul.f32 %v2261_v0, %v2119_v21  ;;  %v2634_v27 = vsel %vm727_vm5, %v729_v38, %v731_v45 }
 0x15c   : > { %v948_v26 = vrot.slane %v942_v10, 3  ;;  %v934_v61 = vrot.slane %v926_v58, 3  ;;  %v1128_v7 = vmul.f32 %v2217_v51, %v2248_v60  ;;  %v3117_v49 = vrot.slane %v2246_v59, 3 }
 0x15d   : > { %v2639_v55 = vsel %vm727_vm5, %v746_v18, %v748_v32  ;;  %v949_v47 = vrot.slane %v943_v9, 3  ;;  %v951_v45 = vrot.slane %v944_v53, 3  ;;  %v1145_v0 = vmul.f32 %v2277_v5, %v2029_v1 }
 0x15e   : > { %v2649_v38 = vsel %vm930_vm4, %v3117_v49, %v932_v62  ;;  %v1146_v18 = vmul.f32 %v2277_v5, %v2119_v21  ;;  %v1129_v59 = vmul.f32 %v2217_v51, %v2540_v8  ;;  %v1147_v58 = vmul.f32 %v2277_v5, %v2350_v14 }
 0x15f   : > { %564 = vrot.lane.b32.xlu0 %v2385_v28, %s3082_s21  ;;  %790 = vrot.lane.b32.xlu1 %v787_v44, %s3082_s21  ;;  %v2658_v48 = vsel %vm930_vm4, %v948_v26, %v949_v47  ;;  %v2661_v28 = vsel %vm930_vm4, %v932_v62, %v934_v61  ;;  %v1135_v44 = vrot.slane %v1128_v7, 4  ;;  %v2666_v10 = vsel %vm930_vm4, %v949_v47, %v951_v45  ;;  %v3122_v45 = vld [vmem:[#allocation38_spill] sm:$0xff] }
 0x160   : > { %v1151_v32 = vrot.slane %v1145_v0, 4  ;;  %v1152_v9 = vrot.slane %v1146_v18, 4  ;;  %v3118_v53 = vrot.slane %v2509_v39, 2  ;;  %v3119_v26 = vrot.slane %v2393_v56, 2  ;;  %v3121_v39 = vld [vmem:[#allocation35_spill] sm:$0xff] }
 0x161   : > { %v870_v61 = vrot.slane %v2522_v52, 2  ;;  %v3120_v7 = vrot.slane %v2274_v4, 4  ;;  %v1137_v47 = vrot.slane %v1129_v59, 4  ;;  %v679_v5 = vmul.f32 %v2145_v31, %v2105_v17  ;;  %v3123_v59 = vld [vmem:[#allocation37_spill] sm:$0xff] }
 0x162   : > { %v829_v62 = vsel %vm727_vm5, %v3119_v26, %v3118_v53  ;;  %v2687_v14 = vsel %vm1133_vm6, %v1151_v32, %v1152_v9  ;;  %v1154_v56 = vrot.slane %v1147_v58, 4  ;;  %v643_v52 = vrot.slane %v3121_v39, 1 }
 0x163   : > { %v2679_v51 = vsel %vm1133_vm6, %v3120_v7, %v1135_v44  ;;  %606 = vrot.lane.b32.xlu0 %v2472_v33, %s3088_s0  ;;  %832 = vrot.lane.b32.xlu1 %v829_v62, %s3088_s0  ;;  %v755_v4 = vstv %s2624_s10  ;;  %v2692_v49 = vsel %vm1133_vm6, %v1135_v44, %v1137_v47  ;;  %v686_v0 = vrot.slane %v3122_v45, 1  ;;  %v3126_v44 = vld [vmem:[#allocation27_spill] sm:$0xff] }
 0x164   : > { %v2696_v33 = vmul.f32 %v755_v4, %v2248_v60  ;;  %v2699_v18 = vsel %vm1133_vm6, %v1152_v9, %v1154_v56  ;;  %v3124_v32 = vrot.slane %v3123_v59, 1  ;;  %v3125_v53 = vrot.slane %v2407_v42, 2 }
 0x165   : > { %v912_v62 = vrot.slane %v2526_v36, 2  ;;  %v555_v7 = vmul.f32 %v3126_v44, %v2540_v8  ;;  %v685_v47 = vrot.slane %v679_v5, 1  ;;  %v756_v9 = vmul.f32 %v755_v4, %v2105_v17 }
 0x166   : > { %v645_v58 = vsel %vm524_vm3, %v643_v52, %v3124_v32  ;;  %v871_v26 = vsel %vm727_vm5, %v3125_v53, %v870_v61  ;;  %v797_v56 = vstv %s2655_s11  ;;  %v3127_v61 = vrot.slane %v2413_v12, 2  ;;  %v3128_v32 = vld [vmem:[#allocation28_spill] sm:$0xff] }
 0x167   : > { %648 = vrot.lane.b32.xlu0 %v645_v58, %s3090_s2  ;;  %874 = vrot.lane.b32.xlu1 %v871_v26, %s3090_s2  ;;  %v687_v39 = vsel %vm524_vm3, %v685_v47, %v686_v0  ;;  %v2716_v42 = vmul.f32 %v797_v56, %v2248_v60  ;;  %v763_v52 = vrot.slane %v2696_v33, 2  ;;  %v562_v45 = vrot.slane %v555_v7, 1 }
 0x168   : > { %v913_v36 = vsel %vm727_vm5, %v3127_v61, %v912_v62  ;;  %v597_v58 = vmul.f32 %v3128_v32, %v2540_v8  ;;  %v762_v5 = vrot.slane %v756_v9, 2  ;;  %v798_v53 = vmul.f32 %v797_v56, %v2105_v17  ;;  %v3129_v62 = vld [vmem:[#allocation36_spill] sm:$0xff] }
 0x169   : > { %v839_v26 = vstv %s1490_s12  ;;  %v805_v44 = vrot.slane %v2716_v42, 2  ;;  %v3130_v7 = vrot.slane %v3129_v62, 1  ;;  %v881_v32 = vstv %s1492_s13 }
 0x16a   : > { %v2729_v12 = vmul.f32 %v839_v26, %v2248_v60  ;;  %v764_v33 = vsel %vm727_vm5, %v762_v5, %v763_v52  ;;  %v604_v61 = vrot.slane %v597_v58, 1  ;;  %v804_v9 = vrot.slane %v798_v53, 2 }
 0x16b   : > { %690 = vrot.lane.b32.xlu0 %v687_v39, %s3093_s9  ;;  %916 = vrot.lane.b32.xlu1 %v913_v36, %s3093_s9  ;;  %v563_v47 = vsel %vm524_vm3, %v3130_v7, %v562_v45  ;;  %v3131_v39 = vld [vmem:[#allocation29_spill] sm:$0xff]  ;;  %v840_v42 = vmul.f32 %v839_v26, %v2105_v17  ;;  %v2742_v5 = vmul.f32 %v881_v32, %v2248_v60  ;;  %v3132_v45 = vrot.slane %v2311_v23, 1 }
 0x16c   : > { %v639_v36 = vmul.f32 %v3131_v39, %v2540_v8  ;;  %v847_v19 = vrot.slane %v2729_v12, 2  ;;  %v806_v62 = vsel %vm727_vm5, %v804_v9, %v805_v44  ;;  %v882_v53 = vmul.f32 %v881_v32, %v2105_v17 }
 0x16d   : > { %v605_v58 = vsel %vm524_vm3, %v3132_v45, %v604_v61  ;;  %v846_v12 = vrot.slane %v840_v42, 2  ;;  %v889_v39 = vrot.slane %v2742_v5, 2  ;;  %v3133_v61 = vrot.slane %v3123_v59, 1 }
 0x16e   : > { %v646_v7 = vrot.slane %v639_v36, 1  ;;  %v888_v42 = vrot.slane %v882_v53, 2  ;;  %v800_v59 = vmul.f32 %v797_v56, %v2540_v8  ;;  %v842_v56 = vmul.f32 %v839_v26, %v2540_v8 }
 0x16f   : > { %767 = vrot.lane.b32.xlu0 %v764_v33, %s3082_s21  ;;  %566 = vrot.lane.b32.xlu1 %v563_v47, %s3082_s21  ;;  %v681_v33 = vmul.f32 %v2145_v31, %v2540_v8  ;;  %v958_v47 = vstv %s1496_s14  ;;  %v848_v23 = vsel %vm727_vm5, %v846_v12, %v847_v19 }
 0x170   : > { %v960_v9 = vmul.f32 %v958_v47, %v2248_v60  ;;  %v647_v36 = vsel %vm524_vm3, %v3133_v61, %v646_v7  ;;  %v959_v45 = vmul.f32 %v958_v47, %v2105_v17  ;;  %v890_v5 = vsel %vm727_vm5, %v888_v42, %v889_v39  ;;  %v3134_v7 = vld [vmem:[#allocation30_spill] sm:$0xff]  ;;  %v3135_v42 = vld [vmem:[#allocation39_spill] sm:$0xff] }
 0x171   : > { %v688_v31 = vrot.slane %v681_v33, 1  ;;  %v980_v33 = vmul.f32 %v3134_v7, %v2029_v1  ;;  %v1042_v7 = vstv %s1500_s22 }
 0x172   : > { %v966_v43 = vrot.slane %v960_v9, 3  ;;  %v807_v9 = vrot.slane %v800_v59, 2 }
 0x173   : > { %809 = vrot.lane.b32.xlu0 %v806_v62, %s3088_s0  ;;  %608 = vrot.lane.b32.xlu1 %v605_v58, %s3088_s0  ;;  %v758_v62 = vmul.f32 %v755_v4, %v2540_v8  ;;  %v689_v58 = vsel %vm524_vm3, %v686_v0, %v688_v31  ;;  %v965_v4 = vrot.slane %v959_v45, 3  ;;  %v3136_v45 = vrot.slane %v3135_v42, 3 }
 0x175   : > { %v765_v12 = vrot.slane %v758_v62, 2  ;;  %v967_v61 = vsel %vm930_vm4, %v965_v4, %v966_v43  ;;  %v849_v4 = vrot.slane %v842_v56, 2  ;;  %v3138_v56 = vrot.slane %v2398_v57, 3 }
 0x177   : > { %851 = vrot.lane.b32.xlu0 %v848_v23, %s3090_s2  ;;  %650 = vrot.lane.b32.xlu1 %v647_v36, %s3090_s2  ;;  %v1000_v23 = vstv %s1498_s20  ;;  %v766_v0 = vsel %vm727_vm5, %v763_v52, %v765_v12  ;;  %v986_v36 = vrot.slane %v980_v33, 3  ;;  %v884_v52 = vmul.f32 %v881_v32, %v2540_v8  ;;  %v3137_v12 = vld [vmem:[#allocation31_spill] sm:$0xff] }
 0x178   : > { %v2771_v53 = vmul.f32 %v1000_v23, %v2248_v60  ;;  %v1001_v31 = vmul.f32 %v1000_v23, %v2105_v17  ;;  %v1022_v59 = vmul.f32 %v3137_v12, %v2029_v1  ;;  %v2790_v33 = vmul.f32 %v1042_v7, %v2248_v60 }
 0x179   : > { %v961_v32 = vmul.f32 %v958_v47, %v2540_v8  ;;  %v3139_v47 = vld [vmem:[#allocation32_spill] sm:$0xff] }
 0x17a   : > { %v1008_v62 = vrot.slane %v2771_v53, 3  ;;  %v1007_v26 = vrot.slane %v1001_v31, 3  ;;  %v1050_v42 = vrot.slane %v2790_v33, 3  ;;  %v3140_v33 = vrot.slane %v2402_v25, 3 }
 0x17b   : > { %893 = vrot.lane.b32.xlu0 %v890_v5, %s3093_s9  ;;  %692 = vrot.lane.b32.xlu1 %v689_v58, %s3093_s9  ;;  %v988_v5 = vsel %vm930_vm4, %v986_v36, %v3136_v45  ;;  %v808_v58 = vsel %vm727_vm5, %v805_v44, %v807_v9  ;;  %v850_v44 = vsel %vm727_vm5, %v847_v19, %v849_v4  ;;  %v968_v45 = vrot.slane %v961_v32, 3 }
 0x17c   : > { %v1009_v53 = vsel %vm930_vm4, %v1007_v26, %v1008_v62  ;;  %v1043_v9 = vmul.f32 %v1042_v7, %v2105_v17  ;;  %v1161_v25 = vstv %s1506_s26 }
 0x17d   : > { %v969_v57 = vsel %vm930_vm4, %v966_v43, %v968_v45  ;;  %v1162_v45 = vmul.f32 %v1161_v25, %v2105_v17 }
 0x17e   : > { %v1049_v19 = vrot.slane %v1043_v9, 3 }
 0x17f   : > { %970 = vrot.lane.b32.xlu0 %v967_v61, %s3082_s21  ;;  %769 = vrot.lane.b32.xlu1 %v766_v0, %s3082_s21  ;;  %v891_v61 = vrot.slane %v884_v52, 2  ;;  %v1028_v0 = vrot.slane %v1022_v59, 3 }
 0x180   : > { %v1051_v4 = vsel %vm930_vm4, %v1049_v19, %v1050_v42 }
 0x181   : > { %v1030_v36 = vsel %vm930_vm4, %v1028_v0, %v3138_v56  ;;  %v892_v31 = vsel %vm727_vm5, %v889_v39, %v891_v61  ;;  %v1003_v39 = vmul.f32 %v1000_v23, %v2540_v8  ;;  %v3141_v61 = vld [vmem:[#allocation33_spill] sm:$0xff] }
 0x182   : > { %v1106_v32 = vmul.f32 %v3141_v61, %v2029_v1 }
 0x183   : > { %991 = vrot.lane.b32.xlu0 %v988_v5, %s3082_s21  ;;  %811 = vrot.lane.b32.xlu1 %v808_v58, %s3088_s0  ;;  %v1064_v5 = vmul.f32 %v3139_v47, %v2029_v1  ;;  %v1084_v58 = vstv %s1502_s15  ;;  %v399_v47 = vstv %s2816_s18 }
 0x184   : > { %v2810_v52 = vmul.f32 %v1084_v58, %v2248_v60  ;;  %v1085_v12 = vmul.f32 %v1084_v58, %v2105_v17 }
 0x185   : > { %v1070_v26 = vrot.slane %v1064_v5, 3  ;;  %v3142_v5 = vrot.slane %v2431_v3, 3 }
 0x186   : > { %v1092_v43 = vrot.slane %v2810_v52, 3  ;;  %v1091_v23 = vrot.slane %v1085_v12, 3  ;;  %v393_v52 = vstv %s2822_s24 }
 0x187   : > { %1012 = vrot.lane.b32.xlu0 %v1009_v53, %s3088_s0  ;;  %853 = vrot.lane.b32.xlu1 %v850_v44, %s3090_s2  ;;  %v1072_v53 = vsel %vm930_vm4, %v1070_v26, %v3140_v33  ;;  %v1010_v44 = vrot.slane %v1003_v39, 3  ;;  %v400_v39 = vmul.f32 %v399_v47, %v2029_v1  ;;  %v1183_v26 = vmul.f32 %v2200_v46, %v2029_v1 }
 0x188   : > { %v1093_v9 = vsel %vm930_vm4, %v1091_v23, %v1092_v43  ;;  %v394_v3 = vmul.f32 %v393_v52, %v2105_v17  ;;  %v1203_v33 = vstv %s1508_s23 }
 0x189   : > { %v1011_v56 = vsel %vm930_vm4, %v1008_v62, %v1010_v44  ;;  %v2856_v23 = vmul.f32 %v1203_v33, %v2248_v60  ;;  %v1189_v61 = vrot.slane %v1183_v26, 4 }
 0x18a   : > { %v402_v46 = vadd.f32 %v400_v39, %v394_v3  ;;  %v1245_v39 = vstv %s1510_s27 }
 0x18b   : > { %1033 = vrot.lane.b32.xlu0 %v1030_v36, %s3088_s0  ;;  %895 = vrot.lane.b32.xlu1 %v892_v31, %s3093_s9  ;;  %v2832_v36 = vmul.f32 %v1161_v25, %v2248_v60  ;;  %v1045_v31 = vmul.f32 %v1042_v7, %v2540_v8  ;;  %v1168_v7 = vrot.slane %v1162_v45, 4  ;;  %v1211_v45 = vrot.slane %v2856_v23, 4 }
 0x18d   : > { %v1169_v62 = vrot.slane %v2832_v36, 4 }
 0x18f   : > { %1054 = vrot.lane.b32.xlu0 %v1051_v4, %s3090_s2  ;;  %972 = vrot.lane.b32.xlu1 %v969_v57, %s3082_s21  ;;  %v1052_v57 = vrot.slane %v1045_v31, 3 }
 0x191   : > { %v425_v59 = vpop.permute.xlu0 %424  ;;  %v1053_v44 = vsel %vm930_vm4, %v1050_v42, %v1052_v57  ;;  %v3144_v57 = vld [vmem:[#allocation34_spill] sm:$0xff] }
 0x193   : > { %1075 = vrot.lane.b32.xlu0 %v1072_v53, %s3090_s2  ;;  %993 = vrot.lane.b32.xlu1 %v2427_v15, %s3082_s21  ;;  %v1112_v15 = vrot.slane %v1106_v32, 3  ;;  %v1170_v53 = vsel %vm1133_vm6, %v1168_v7, %v1169_v62  ;;  %v1204_v32 = vmul.f32 %v1203_v33, %v2105_v17  ;;  %v1225_v7 = vmul.f32 %v3144_v57, %v2029_v1 }
 0x194   : > { %v1246_v1 = vmul.f32 %v1245_v39, %v2105_v17  ;;  %v401_v57 = vmul.f32 %v399_v47, %v2119_v21 }
 0x195   : > { %v453_v0 = vpop.permute.xlu0 %452  ;;  %v1114_v4 = vsel %vm930_vm4, %v1112_v15, %v3142_v5  ;;  %v3143_v15 = vrot.slane %v2476_v2, 4  ;;  %v2872_v2 = vmul.f32 %v1245_v39, %v2248_v60 }
 0x197   : > { %1096 = vrot.lane.b32.xlu0 %v1093_v9, %s3093_s9  ;;  %1014 = vrot.lane.b32.xlu1 %v1011_v56, %s3088_s0  ;;  %v1191_v42 = vsel %vm1133_vm6, %v1189_v61, %v3143_v15  ;;  %v3145_v15 = vrot.slane %v2500_v40, 4  ;;  %v395_v40 = vmul.f32 %v393_v52, %v2248_v60 }
 0x199   : > { %v481_v19 = vpop.permute.xlu0 %480 }
 0x19b   : > { %1117 = vrot.lane.b32.xlu0 %v1114_v4, %s3093_s9  ;;  %1035 = vrot.lane.b32.xlu1 %v2450_v13, %s3088_s0  ;;  %v1087_v13 = vmul.f32 %v1084_v58, %v2540_v8  ;;  %v1210_v4 = vrot.slane %v1204_v32, 4 }
 0x19d   : > { %v509_v12 = vpop.permute.xlu0 %508  ;;  %v1094_v5 = vrot.slane %v1087_v13, 3 }
 0x19f   : > { %1173 = vrot.lane.b32.xlu0 %v1170_v53, %s3082_s21  ;;  %1056 = vrot.lane.b32.xlu1 %v1053_v44, %s3090_s2  ;;  %v1212_v44 = vsel %vm1133_vm6, %v1210_v4, %v1211_v45  ;;  %v1095_v13 = vsel %vm930_vm4, %v1092_v43, %v1094_v5  ;;  %v1252_v5 = vrot.slane %v1246_v1, 4  ;;  %v1206_v1 = vmul.f32 %v1203_v33, %v2540_v8 }
 0x1a1   : > { %v427_v9 = vpop.permute.xlu1 %426  ;;  %v411_v56 = vpop.permute.xlu0 %410 }
 0x1a2   : > { %v416_v31 = vadd.f32 %v411_v56, %v402_v46  ;;  %v1231_v46 = vrot.slane %v1225_v7, 4  ;;  %v1253_v56 = vrot.slane %v2872_v2, 4 }
 0x1a3   : > { %1194 = vrot.lane.b32.xlu0 %v1191_v42, %s3082_s21  ;;  %1077 = vrot.lane.b32.xlu1 %v2455_v24, %s3090_s2  ;;  %v1164_v24 = vmul.f32 %v1161_v25, %v2540_v8  ;;  %v3146_v25 = vld [vmem:[#allocation40_spill] sm:$0xff] }
 0x1a4   : > { %v430_v58 = vadd.f32 %v425_v59, %v416_v31  ;;  %v1233_v42 = vsel %vm1133_vm6, %v1231_v46, %v3145_v15  ;;  %v1254_v2 = vsel %vm1133_vm6, %v1252_v5, %v1253_v56  ;;  %v3147_v46 = vrot.slane %v2516_v11, 4 }
 0x1a5   : > { %v455_v26 = vpop.permute.xlu1 %454  ;;  %v439_v3 = vpop.permute.xlu0 %438  ;;  %v1171_v43 = vrot.slane %v1164_v24, 4  ;;  %v1248_v5 = vmul.f32 %v1245_v39, %v2540_v8 }
 0x1a6   : > { %v444_v53 = vadd.f32 %v439_v3, %v430_v58  ;;  %v1621_v58 = vld [vmem:[#allocation5] sm:$0xff] }
 0x1a7   : > { %1215 = vrot.lane.b32.xlu0 %v1212_v44, %s3088_s0  ;;  %1098 = vrot.lane.b32.xlu1 %v1095_v13, %s3093_s9  ;;  %v1172_v13 = vsel %vm1133_vm6, %v1169_v62, %v1171_v43 }
 0x1a8   : > { %v458_v59 = vadd.f32 %v453_v0, %v444_v53  ;;  %v1267_v0 = vmul.f32 %v1621_v58, %v2214_v50  ;;  %v1287_v53 = vstv %s1512_s28 }
 0x1a9   : > { %v483_v61 = vpop.permute.xlu1 %482  ;;  %v467_v32 = vpop.permute.xlu0 %466  ;;  %v1289_v24 = vmul.f32 %v1287_v53, %v2248_v60  ;;  %v1288_v47 = vmul.f32 %v1287_v53, %v2105_v17  ;;  %v1213_v60 = vrot.slane %v1206_v1, 4  ;;  %v1309_v17 = vmul.f32 %v1621_v58, %v2228_v54 }
 0x1aa   : > { %v472_v31 = vadd.f32 %v467_v32, %v458_v59  ;;  %v1273_v21 = vrot.slane %v1267_v0, 4  ;;  %v3148_v0 = vrot.slane %v2530_v30, 4 }
 0x1ab   : > { %1236 = vrot.lane.b32.xlu0 %v1233_v42, %s3088_s0  ;;  %1119 = vrot.lane.b32.xlu1 %v3146_v25, %s3093_s9  ;;  %v1295_v32 = vrot.slane %v1289_v24, 4 }
 0x1ac   : > { %v486_v4 = vadd.f32 %v481_v19, %v472_v31  ;;  %v403_v19 = vadd.f32 %v401_v57, %v395_v40  ;;  %v1275_v36 = vsel %vm1133_vm6, %v1273_v21, %v3147_v46  ;;  %v1294_v31 = vrot.slane %v1288_v47, 4 }
 0x1ad   : > { %v511_v7 = vpop.permute.xlu1 %510  ;;  %v495_v3 = vpop.permute.xlu0 %494  ;;  %v1255_v57 = vrot.slane %v1248_v5, 4 }
 0x1ae   : > { %v500_v44 = vadd.f32 %v495_v3, %v486_v4  ;;  %v1296_v25 = vsel %vm1133_vm6, %v1294_v31, %v1295_v32 }
 0x1af   : > { %1257 = vrot.lane.b32.xlu0 %v1254_v2, %s3090_s2  ;;  %1175 = vrot.lane.b32.xlu1 %v1172_v13, %s3082_s21  ;;  %v1290_v2 = vmul.f32 %v1287_v53, %v2540_v8 }
 0x1b0   : > { %v514_v50 = vadd.f32 %v509_v12, %v500_v44 }
 0x1b1   : > { %v413_v52 = vpop.permute.xlu1 %412  ;;  %v586_v59 = vpop.permute.xlu0 %585  ;;  %v1297_v13 = vrot.slane %v1290_v2, 4 }
 0x1b2   : > { %v417_v62 = vadd.f32 %v413_v52, %v403_v19  ;;  %v532_v33 = vadd.f32 %v2593_v20, %v514_v50  ;;  %v1214_v20 = vsel %vm1133_vm6, %v1211_v45, %v1213_v60 }
 0x1b3   : > { %1278 = vrot.lane.b32.xlu0 %v1275_v36, %s3090_s2  ;;  %1196 = vrot.lane.b32.xlu1 %v2536_v34, %s3082_s21  ;;  %v1298_v21 = vsel %vm1133_vm6, %v1295_v32, %v1297_v13  ;;  %s1344_s21 = scalar_lea.sflag [#allocation8], %s3149_s29 }
 0x1b4   : > { %v431_v12 = vadd.f32 %v427_v9, %v417_v62  ;;  %v549_v15 = vadd.f32 %v2600_v22, %v532_v33  ;;  %v1315_v9 = vrot.slane %v1309_v17, 4 }
 0x1b5   : > { %v441_v42 = vpop.permute.xlu1 %440  ;;  %v628_v11 = vpop.permute.xlu0 %627 }
 0x1b6   : > { %v445_v43 = vadd.f32 %v441_v42, %v431_v12  ;;  %v1317_v4 = vsel %vm1133_vm6, %v1315_v9, %v3148_v0 }
 0x1b7   : > { %1299 = vrot.lane.b32.xlu0 %v1296_v25, %s3093_s9  ;;  %1217 = vrot.lane.b32.xlu1 %v1214_v20, %s3088_s0 }
 0x1b8   : > { %v459_v34 = vadd.f32 %v455_v26, %v445_v43  ;;  %v1256_v26 = vsel %vm1133_vm6, %v1253_v56, %v1255_v57 }
 0x1b9   : > { %v469_v54 = vpop.permute.xlu1 %468  ;;  %v670_v58 = vpop.permute.xlu0 %669 }
 0x1ba   : > { %v473_v22 = vadd.f32 %v469_v54, %v459_v34 }
 0x1bb   : > { %1320 = vrot.lane.b32.xlu0 %v1317_v4, %s3093_s9  ;;  %1238 = vrot.lane.b32.xlu1 %v2555_v35, %s3088_s0  ;;  %s1769_s0 = smov [#allocation11]  }
 0x1bc   : > { %v487_v23 = vadd.f32 %v483_v61, %v473_v22  ;;  %s1669_s1 = sshll.u32 %s1769_s0, 4  ;;  %s1670_s1 = int_to_ptr.vmem [resolvable:$false] %s1669_s1 }
 0x1bd   : > { %v497_v45 = vpop.permute.xlu1 %496  ;;  %v712_v39 = vpop.permute.xlu0 %711  ;;  %p1672_p0 = scmp.lt.s32.totalorder %s2953_s7, %s1670_s1 }
 0x1be   : > { %v501_v3 = vadd.f32 %v497_v45, %v487_v23 }
 0x1bf   : > { %1259 = vrot.lane.b32.xlu1 %v1256_v26, %s3090_s2 }
 0x1c0   : > { %v515_v40 = vadd.f32 %v511_v7, %v501_v3 }
 0x1c1   : > { %v588_v30 = vpop.permute.xlu1 %587  ;;  %v789_v44 = vpop.permute.xlu0 %788 }
 0x1c2   : > { %v533_v24 = vadd.f32 %v2603_v37, %v515_v40 }
 0x1c3   : > { %1280 = vrot.lane.b32.xlu1 %v2570_v29, %s3090_s2  ;;  %s1671_s2 = scalar_lea.vmem %s1670_s1, 512 }
 0x1c4   : > { %v550_v35 = vadd.f32 %v2608_v6, %v533_v24  ;;  %p1673_p3 = scmp.lt.s32.totalorder %s1671_s2, %s1665_s6 }
 0x1c5   : > { %v630_v61 = vpop.permute.xlu1 %629  ;;  %v831_v1 = vpop.permute.xlu0 %830 }
 0x1c6   : > { %p1674_p5 = por %p1673_p3, %p1672_p0 }
 0x1c7   : > { %1301 = vrot.lane.b32.xlu1 %v1298_v21, %s3093_s9 }
 0x1c8   : > { %p1675_p11 = pnand %p1674_p5, %p1668_p12 }
 0x1c9   : > { %v672_v8 = vpop.permute.xlu1 %671  ;;  %v873_v56 = vpop.permute.xlu0 %872 }
 0x1cb   : > { %1322 = vrot.lane.b32.xlu1 %v2586_v16, %s3093_s9 }
 0x1cd   : > { %v714_v7 = vpop.permute.xlu1 %713  ;;  %v915_v53 = vpop.permute.xlu0 %914 }
 0x1d1   : > { %v791_v50 = vpop.permute.xlu1 %790  ;;  %v565_v37 = vpop.permute.xlu0 %564 }
 0x1d2   : > { %v570_v19 = vadd.f32 %v565_v37, %v549_v15 }
 0x1d4   : > { %v591_v47 = vadd.f32 %v586_v59, %v570_v19 }
 0x1d5   : > { %v833_v29 = vpop.permute.xlu1 %832  ;;  %v607_v52 = vpop.permute.xlu0 %606 }
 0x1d6   : > { %v612_v6 = vadd.f32 %v607_v52, %v591_v47 }
 0x1d8   : > { %v633_v46 = vadd.f32 %v628_v11, %v612_v6 }
 0x1d9   : > { %v875_v36 = vpop.permute.xlu1 %874  ;;  %v649_v62 = vpop.permute.xlu0 %648 }
 0x1da   : > { %v654_v32 = vadd.f32 %v649_v62, %v633_v46 }
 0x1dc   : > { %v675_v60 = vadd.f32 %v670_v58, %v654_v32 }
 0x1dd   : > { %v917_v33 = vpop.permute.xlu1 %916  ;;  %v691_v12 = vpop.permute.xlu0 %690 }
 0x1de   : > { %v696_v31 = vadd.f32 %v691_v12, %v675_v60 }
 0x1e0   : > { %v717_v17 = vadd.f32 %v712_v39, %v696_v31 }
 0x1e1   : > { %v567_v42 = vpop.permute.xlu1 %566  ;;  %v768_v16 = vpop.permute.xlu0 %767 }
 0x1e2   : > { %v571_v43 = vadd.f32 %v567_v42, %v550_v35  ;;  %v735_v25 = vadd.f32 %v2618_v41, %v717_v17 }
 0x1e4   : > { %v752_v15 = vadd.f32 %v2627_v63, %v735_v25  ;;  %v592_v59 = vadd.f32 %v588_v30, %v571_v43 }
 0x1e5   : > { %v609_v20 = vpop.permute.xlu1 %608  ;;  %v810_v5 = vpop.permute.xlu0 %809 }
 0x1e6   : > { %v773_v34 = vadd.f32 %v768_v16, %v752_v15  ;;  %v613_v11 = vadd.f32 %v609_v20, %v592_v59 }
 0x1e8   : > { %v794_v9 = vadd.f32 %v789_v44, %v773_v34  ;;  %v634_v54 = vadd.f32 %v630_v61, %v613_v11 }
 0x1e9   : > { %v651_v22 = vpop.permute.xlu1 %650  ;;  %v852_v58 = vpop.permute.xlu0 %851 }
 0x1ea   : > { %v815_v0 = vadd.f32 %v810_v5, %v794_v9  ;;  %v655_v4 = vadd.f32 %v651_v22, %v634_v54 }
 0x1ec   : > { %v836_v57 = vadd.f32 %v831_v1, %v815_v0  ;;  %v676_v23 = vadd.f32 %v672_v8, %v655_v4 }
 0x1ed   : > { %v693_v45 = vpop.permute.xlu1 %692  ;;  %v894_v39 = vpop.permute.xlu0 %893 }
 0x1ee   : > { %v857_v3 = vadd.f32 %v852_v58, %v836_v57  ;;  %v697_v26 = vadd.f32 %v693_v45, %v676_v23 }
 0x1f0   : > { %v718_v41 = vadd.f32 %v714_v7, %v697_v26  ;;  %v878_v2 = vadd.f32 %v873_v56, %v857_v3 }
 0x1f1   : > { %v770_v63 = vpop.permute.xlu1 %769  ;;  %v971_v40 = vpop.permute.xlu0 %970 }
 0x1f2   : > { %v899_v30 = vadd.f32 %v894_v39, %v878_v2  ;;  %v736_v13 = vadd.f32 %v2634_v27, %v718_v41 }
 0x1f4   : > { %v920_v24 = vadd.f32 %v915_v53, %v899_v30  ;;  %v753_v44 = vadd.f32 %v2639_v55, %v736_v13 }
 0x1f5   : > { %v812_v35 = vpop.permute.xlu1 %811  ;;  %v992_v61 = vpop.permute.xlu0 %991 }
 0x1f6   : > { %v774_v21 = vadd.f32 %v770_v63, %v753_v44  ;;  %v938_v1 = vadd.f32 %v2649_v38, %v920_v24 }
 0x1f8   : > { %v955_v8 = vadd.f32 %v2658_v48, %v938_v1  ;;  %v795_v37 = vadd.f32 %v791_v50, %v774_v21 }
 0x1f9   : > { %v854_v19 = vpop.permute.xlu1 %853  ;;  %v1013_v47 = vpop.permute.xlu0 %1012 }
 0x1fa   : > { %v976_v7 = vadd.f32 %v971_v40, %v955_v8  ;;  %v816_v56 = vadd.f32 %v812_v35, %v795_v37 }
 0x1fc   : > { %v997_v52 = vadd.f32 %v992_v61, %v976_v7  ;;  %v837_v6 = vadd.f32 %v833_v29, %v816_v56 }
 0x1fd   : > { %v896_v46 = vpop.permute.xlu1 %895  ;;  %v1034_v62 = vpop.permute.xlu0 %1033 }
 0x1fe   : > { %v858_v27 = vadd.f32 %v854_v19, %v837_v6  ;;  %v1018_v53 = vadd.f32 %v1013_v47, %v997_v52 }
 0x200   : > { %v879_v32 = vadd.f32 %v875_v36, %v858_v27  ;;  %v1039_v17 = vadd.f32 %v1034_v62, %v1018_v53 }
 0x201   : > { %v973_v55 = vpop.permute.xlu1 %972  ;;  %v1055_v60 = vpop.permute.xlu0 %1054 }
 0x202   : > { %v900_v12 = vadd.f32 %v896_v46, %v879_v32  ;;  %v1060_v16 = vadd.f32 %v1055_v60, %v1039_v17 }
 0x204   : > { %v921_v31 = vadd.f32 %v917_v33, %v900_v12 }
 0x205   : > { %v994_v38 = vpop.permute.xlu1 %993  ;;  %v1076_v42 = vpop.permute.xlu0 %1075 }
 0x206   : > { %v939_v48 = vadd.f32 %v2661_v28, %v921_v31  ;;  %v1081_v15 = vadd.f32 %v1076_v42, %v1060_v16 }
 0x208   : > { %v956_v50 = vadd.f32 %v2666_v10, %v939_v48 }
 0x209   : > { %v1015_v43 = vpop.permute.xlu1 %1014  ;;  %v1097_v25 = vpop.permute.xlu0 %1096 }
 0x20a   : > { %v977_v29 = vadd.f32 %v973_v55, %v956_v50  ;;  %v1102_v20 = vadd.f32 %v1097_v25, %v1081_v15 }
 0x20c   : > { %v998_v59 = vadd.f32 %v994_v38, %v977_v29 }
 0x20d   : > { %v1036_v5 = vpop.permute.xlu1 %1035  ;;  %v1118_v36 = vpop.permute.xlu0 %1117 }
 0x20e   : > { %v1123_v34 = vadd.f32 %v1118_v36, %v1102_v20  ;;  %v1019_v11 = vadd.f32 %v1015_v43, %v998_v59 }
 0x210   : > { %v1141_v33 = vadd.f32 %v2679_v51, %v1123_v34  ;;  %v1040_v28 = vadd.f32 %v1036_v5, %v1019_v11 }
 0x211   : > { %v1057_v9 = vpop.permute.xlu1 %1056  ;;  %v1174_v54 = vpop.permute.xlu0 %1173 }
 0x212   : > { %v1158_v22 = vadd.f32 %v2687_v14, %v1141_v33  ;;  %v1061_v0 = vadd.f32 %v1057_v9, %v1040_v28 }
 0x214   : > { %v1179_v26 = vadd.f32 %v1174_v54, %v1158_v22 }
 0x215   : > { %v1078_v58 = vpop.permute.xlu1 %1077  ;;  %v1195_v10 = vpop.permute.xlu0 %1194 }
 0x216   : > { %v1082_v23 = vadd.f32 %v1078_v58, %v1061_v0  ;;  %v1200_v40 = vadd.f32 %v1195_v10, %v1179_v26 }
 0x219   : > { %v1099_v4 = vpop.permute.xlu1 %1098  ;;  %v1216_v57 = vpop.permute.xlu0 %1215 }
 0x21a   : > { %v1103_v45 = vadd.f32 %v1099_v4, %v1082_v23  ;;  %v1221_v14 = vadd.f32 %v1216_v57, %v1200_v40 }
 0x21d   : > { %v1120_v39 = vpop.permute.xlu1 %1119  ;;  %v1237_v3 = vpop.permute.xlu0 %1236 }
 0x21e   : > { %v1124_v41 = vadd.f32 %v1120_v39, %v1103_v45  ;;  %v1242_v44 = vadd.f32 %v1237_v3, %v1221_v14 }
 0x220   : > { %v1142_v2 = vadd.f32 %v2692_v49, %v1124_v41 }
 0x221   : > { %v1176_v63 = vpop.permute.xlu1 %1175  ;;  %v1258_v51 = vpop.permute.xlu0 %1257 }
 0x222   : > { %v1159_v30 = vadd.f32 %v2699_v18, %v1142_v2  ;;  %v1263_v35 = vadd.f32 %v1258_v51, %v1242_v44 }
 0x224   : > { %v1180_v47 = vadd.f32 %v1176_v63, %v1159_v30 }
 0x225   : > { %v1197_v13 = vpop.permute.xlu1 %1196  ;;  %v1279_v24 = vpop.permute.xlu0 %1278 }
 0x226   : > { %v1284_v1 = vadd.f32 %v1279_v24, %v1263_v35  ;;  %v1201_v52 = vadd.f32 %v1197_v13, %v1180_v47 }
 0x229   : > { %v1218_v61 = vpop.permute.xlu1 %1217  ;;  %v1300_v21 = vpop.permute.xlu0 %1299 }
 0x22a   : > { %v1305_v8 = vadd.f32 %v1300_v21, %v1284_v1  ;;  %v1222_v6 = vadd.f32 %v1218_v61, %v1201_v52 }
 0x22d   : > { %v1239_v37 = vpop.permute.xlu1 %1238  ;;  %v1321_v19 = vpop.permute.xlu0 %1320 }
 0x22e   : > { %v1326_v7 = vadd.f32 %v1321_v19, %v1305_v8  ;;  %v1243_v46 = vadd.f32 %v1239_v37, %v1222_v6 }
 0x230   : > { %v1514_v56 = vmul.f32 -1.442695, %v1326_v7 }
 0x231   : > { %v1260_v49 = vpop.permute.xlu1 %1259 }
 0x232   : > { %1613 = vpow2.f32 %v1514_v56  ;;  %v1264_v62 = vadd.f32 %v1260_v49, %v1243_v46 }
 0x235   : > { %v1281_v18 = vpop.permute.xlu1 %1280 }
 0x236   : > { %v1285_v53 = vadd.f32 %v1281_v18, %v1264_v62 }
 0x239   : > { %v1302_v27 = vpop.permute.xlu1 %1301 }
 0x23a   : > { %v1306_v55 = vadd.f32 %v1302_v27, %v1285_v53 }
 0x23c   : > { %v1614_v32 = vpop.eup %1613 }
 0x23d   : > { %v1334_v60 = vadd.f32 1.0, %v1614_v32  ;;  %v1323_v12 = vpop.permute.xlu1 %1322 }
 0x23e   : > { %v1327_v31 = vadd.f32 %v1323_v12, %v1306_v55 }
 0x23f   : > { %1615 = vrcp.f32 %v1334_v60 }
 0x240   : > { %v1515_v17 = vmul.f32 -1.442695, %v1327_v31 }
 0x242   : > { %1617 = vpow2.f32 %v1515_v17 }
 0x249   : > { %v1616_v38 = vpop.eup %1615 }
 0x24a   : > { %1341 = vst.msk [vmem:[%s187_s3] sm:$0xff] %vm1340_vm7, %v1616_v38 }
 0x24c   : > { %v1618_v42 = vpop.eup %1617 }
 0x24d   : > { %v1335_v48 = vadd.f32 1.0, %v1618_v42 }
 0x24f   : > { %1619 = vrcp.f32 %v1335_v48 }
 0x259   : > { %v1620_v50 = vpop.eup %1619 }
 0x25a   : > { %1342 = vst.msk [vmem:[%s187_s3 + $0x8] sm:$0xff] %vm1340_vm7, %v1620_v50 }
 0x25b   : > { %1678 = shalt.err (!%p1675_p11)
}
 0x25c   : > { %s1679_s9 = scalar_lea.hbm %s2951_s19, 256  ;;  %s1683_s12 = scalar_lea.hbm %s3152_s8, 512 }
 0x25d   : > { %p1680_p13 = scmp.ne.s32.totalorder %s2951_s19, %s1679_s9  ;;  %p1684_p6 = scmp.lt.u32.totalorder %s2951_s19, %s3152_s8 }
 0x25e   : > { %p1685_p9 = scmp.lt.u32.totalorder %s1683_s12, %s1679_s9  ;;  %p1687_p4 = scmp.lt.u32.totalorder %s1679_s9, %s2951_s19 }
 0x25f   : > { %p1681_p7 = pnand %p1680_p13, %p3153_p8 }
 0x260   : > { %p1686_p1 = por %p1685_p9, %p1684_p6 }
 0x261   : > { %p1682_p10 = pneg %p1681_p7 }
 0x262   : > { %p1688_p2 = por %p1687_p4, %p1686_p1 }
 0x264   : > { %p1689_p12 = pnand %p1688_p2, %p1682_p10 }
 0x266   : > { %1692 = shalt.err (!%p1689_p12)
}
 0x267   : > { %s1770_s20 = smov 128   ;;  %s1771_s22 = smov 8  }
 0x268   : > { %1529 = dma.vmem_to_hbm [thread:$0]  (%p3153_p8), %s2953_s7, 256, %s2951_s19, %s1344_s21, %s1770_s20, %s1770_s20, %s1771_s22  }
 0x269 PF: > { %s3154_s15 = sld [smem:[#allocation15_spill]]  ;;  %s3155_s26 = sld [smem:[#allocation21_spill]] }
 0x26a   : > { %s3156_s18 = sld [smem:[#allocation20_spill]] }
 0x26f   : > { %s1372_s24 = sand.u32 1, %s3154_s15   ;;  %p3157_p0 = scmp.ne.s32.totalorder %s3155_s26, 0 }
 0x270   : > { %p3158_p3 = scmp.ge.s32.totalorder %s3156_s18, 2  ;;  %s1373_s23 = scalar_lea.sflag [#allocation8], %s1372_s24 }
 0x272   : > { %p1540_p5 = pnand %p3158_p3, %p3157_p0 }
 0x274   : > { %1726 = dma.done.wait (!%p1540_p5), %s1373_s23, 256  }
 0x275   : > { %1728 = vsyncadd (!%p1540_p5), %s1373_s23, 4294967040  ;;  %s19_s14 = sadd.s32 1, %s3156_s18   ;;  %s3159_s9 = sld [smem:[#allocation16_spill]] }
 0x276   : > { %p16_p11 = scmp.ge.s32.totalorder %s19_s14, 4   ;;  %s3160_s10 = sld [smem:[#allocation17_spill]] }
 0x277   : > { %s3161_s11 = sld [smem:[#allocation24_spill]]  ;;  %s3162_s12 = sld [smem:[#allocation19_spill]] }
 0x278   : > { %s3163_s13 = sld [smem:[#allocation22_spill]]  ;;  %18 = sbr.rel (!%p16_p11) target bundleno = 11 (0xb), region = 86 }
 0x27f   :  { %1378 = vsyncpa [#allocation7], 1 }
 0x280   :  { %1380 = vsyncpa [#allocation7 + $0x1], 1 }
 0x281   :  { %1381 = vsyncpa [#allocation8], 1 }
 0x282   :  { %1383 = vsyncpa [#allocation8 + $0x1], 1 }
 0x283   :  { %1384 = vsyncpa [#allocation9], 1 }
 0x284   :  { %1386 = vsyncpa [#allocation9 + $0x1], 1 }

</bundles_post_ra>
